<compile_context>
chip_gen: v5e
topology: v5e:2x2
jax: 0.10.0
libtpu: 0.0.40
codegen_flags: <defaults>
</compile_context>

<pallas_src>
import functools

import jax
import jax.numpy as jnp
from jax.experimental import pallas as pl
from jax.experimental.pallas import tpu as pltpu


_DEFAULT_VMEM_CAP = 64 << 20     # conservative fallback (v7x-sized) if undetectable
_VMEM_HEADROOM = 8 << 20         # reserved for compiler-internal scratch


def _vmem_capacity_bytes():
    """(physical VMEM bytes per core, detected?) with a conservative fallback."""
    try:
        info = pltpu.get_tpu_info()
        cap = int(getattr(info, "vmem_capacity_bytes"))
        if cap > 0:
            return cap, True
    except Exception:
        pass
    return _DEFAULT_VMEM_CAP, False


def _supports_single_buffer():
    """Feature-detect BlockSpec(pipeline_mode=pl.Buffered(1)) on this JAX version."""
    if not hasattr(pl, "Buffered"):
        return False
    try:
        pl.BlockSpec((8, 128), lambda i: (i, 0), pipeline_mode=pl.Buffered(1))
        return True
    except TypeError:
        return False


def _vmem_estimate(tt, tf, H, out_itemsize, direct_acc, x_bufs):
    """Rough VMEM footprint of one pipelined step, incl. materialized temporaries."""
    weights = 2 * (H * 2 * tf + tf * H) * 2      # w13 + w2 tiles, double-buffered bf16
    x = x_bufs * tt * H * 2                      # x token tile (bf16)
    out = 2 * tt * H * out_itemsize              # output tile, double-buffered
    acc = 0 if direct_acc else tt * H * 4        # f32 scratch accumulator
    interm = (tt * 2 * tf * 4                    # gu (f32)
              + tt * tf * 4                      # silu(gate) * up (f32)
              + tt * tf * 2                      # h cast to bf16
              + tt * H * 4)                      # partial down-proj result (f32)
    return weights + x + out + acc + interm


def _mlp_kernel(x_ref, w13_ref, w2_ref, o_ref, *scratch, tf, direct_acc):
    f = pl.program_id(2)
    acc_ref = o_ref if direct_acc else scratch[0]

    x = x_ref[...]                                                      # (tt, H) bf16
    # One fused GEMM for gate+up: the w13 tile is [w1 chunk | w3 chunk], each tf wide.
    gu = jnp.dot(x, w13_ref[...], preferred_element_type=jnp.float32)  # (tt, 2*tf)
    gate = gu[:, :tf]
    up = gu[:, tf:]
    h = (gate * jax.nn.sigmoid(gate)) * up                             # SiLU(gate) * up
    partial = jnp.dot(h.astype(w2_ref.dtype), w2_ref[...],
                      preferred_element_type=jnp.float32)              # (tt, H)

    @pl.when(f == 0)
    def _():
        acc_ref[...] = partial          # first step: plain store (no zero + RMW)

    @pl.when(f > 0)
    def _():
        acc_ref[...] += partial

    if not direct_acc:
        @pl.when(f == pl.num_programs(2) - 1)
        def _():
            o_ref[...] = acc_ref[...].astype(o_ref.dtype)


def pack_weights(w1, w2, w3, *, tf=None, dtype=jnp.bfloat16):
    """Pack PyTorch-layout MixtralBlockSparseTop2MLP weights for the kernel.

    w1, w3: (F, H) nn.Linear weights (out_features, in_features) - gate / up proj.
    w2:     (H, F) nn.Linear weight - down proj.

    Returns:
      w13_packed: (F//tf, H, 2*tf); tile i is [w1^T tile_i | w3^T tile_i], contiguous
                  in HBM so each weight-tile DMA is a single contiguous region.
      w2_packed:  (F//tf, tf, H) per-tile-contiguous w2^T.
    """
    Fdim, H = w1.shape
    assert w3.shape == (Fdim, H) and w2.shape == (H, Fdim)

    if tf is None:
        cap, _ = _vmem_capacity_bytes()
        divisors = [c for c in (1024, 512, 256, 128) if Fdim % c == 0]
        tf = Fdim if not divisors else divisors[-1]
        for cand in divisors:   # largest ffn tile whose double-buffered weights fit
            if 2 * (H * 2 * cand + cand * H) * 2 <= 0.45 * cap:
                tf = cand
                break
    assert Fdim % tf == 0, "ffn_dim must be divisible by the ffn tile size"
    nt = Fdim // tf

    w13 = jnp.concatenate(
        [w1.T.reshape(H, nt, tf), w3.T.reshape(H, nt, tf)], axis=2)     # (H, nt, 2tf)
    w13 = jnp.moveaxis(w13, 1, 0)                                       # (nt, H, 2tf)
    w2p = w2.T.reshape(nt, tf, H)                                       # (nt, tf, H)
    return w13.astype(dtype), w2p.astype(dtype)


def mixtral_mlp(x, w13_packed, w2_packed, *, tt=None, n_split=None):
    """Fused expert MLP forward.

    x:          (T, H) activations (any float dtype; fed to the MXU as bf16).
    w13_packed: (F//tf, H, 2*tf) from pack_weights().
    w2_packed:  (F//tf, tf, H)   from pack_weights().
    Returns (T, H) in x.dtype.
    """
    T, H = x.shape
    nt, Hw, twotf = w13_packed.shape
    tf = twotf // 2
    F = nt * tf
    assert Hw == H, "hidden dim mismatch between x and packed weights"
    assert w2_packed.shape == (nt, tf, H)

    out_dtype = x.dtype
    xb = x.astype(jnp.bfloat16)

    cap, cap_known = _vmem_capacity_bytes()
    budget = cap - _VMEM_HEADROOM

    # Single-buffer the x tile only on small-VMEM (v7x-class) chips: its block index
    # never changes along the inner reduction axis, so nothing is lost and tt*H*2
    # bytes are freed for a larger tile.
    single_buffer_x = (cap_known and cap <= (80 << 20) and nt >= 2
                       and _supports_single_buffer())
    x_bufs = 1 if single_buffer_x else 2

    # Decode path: small T -> split the F reduction across a leading size-2
    # "parallel" axis so both TensorCores (v7x) stream half the weights each.
    # (Correct and near-free on single-core chips too at decode-scale T.)
    if n_split is None:
        n_split = 2 if (T <= 256 and nt >= 2 and nt % 2 == 0) else 1
    assert nt % n_split == 0
    npf = nt // n_split

    # Accumulate straight into the output block whenever partials are f32.
    direct_acc = (out_dtype == jnp.float32) or (n_split > 1)
    part_dtype = jnp.float32 if direct_acc else out_dtype
    part_isz = jnp.dtype(part_dtype).itemsize

    # Token tiling: largest tile that fits the VMEM budget (conservative f32-output
    # estimate), so prefill becomes MXU-bound instead of weight-bandwidth-bound.
    if tt is None:
        fitting = [c for c in (1024, 768, 512, 384, 256, 128)
                   if _vmem_estimate(c, tf, H, 4, False, x_bufs) <= budget]
        best = fitting[0] if fitting else 128
        tt = T if T <= best else best
    if T <= tt:
        tt = T
        Tp = T
    else:
        assert tt % 16 == 0, "bf16 token tile must be a multiple of 16 sublanes"
        Tp = pl.cdiv(T, tt) * tt
        if Tp != T:
            xb = jnp.pad(xb, ((0, Tp - T), (0, 0)))   # zero rows -> zero outputs

    grid = (n_split, Tp // tt, npf)
    scratch = [] if direct_acc else [pltpu.VMEM((tt, H), jnp.float32)]

    x_spec_kwargs = {"pipeline_mode": pl.Buffered(1)} if single_buffer_x else {}
    in_specs = [
        pl.BlockSpec((tt, H), lambda s, t, f: (t, 0), **x_spec_kwargs),
        pl.BlockSpec((None, H, 2 * tf), lambda s, t, f: (s * npf + f, 0, 0)),
        pl.BlockSpec((None, tf, H), lambda s, t, f: (s * npf + f, 0, 0)),
    ]
    out_spec = pl.BlockSpec((None, tt, H), lambda s, t, f: (s, t, 0))

    est = _vmem_estimate(tt, tf, H, part_isz, direct_acc, x_bufs)
    vmem_limit = int(min(max(est + (4 << 20), 32 << 20), budget))

    kernel = functools.partial(_mlp_kernel, tf=tf, direct_acc=direct_acc)

    partials = pl.pallas_call(
        kernel,
        out_shape=jax.ShapeDtypeStruct((n_split, Tp, H), part_dtype),
        grid_spec=pltpu.PrefetchScalarGridSpec(
            num_scalar_prefetch=0,
            grid=grid,
            in_specs=in_specs,
            out_specs=out_spec,
            scratch_shapes=scratch,
        ),
        compiler_params=pltpu.CompilerParams(
            dimension_semantics=("parallel", "parallel", "arbitrary"),
            vmem_limit_bytes=vmem_limit,
        ),
    )(xb, w13_packed, w2_packed)

    out = partials[0] if n_split == 1 else jnp.sum(partials, axis=0)
    out = out.astype(out_dtype)
    return out[:T] if Tp != T else out


if __name__ == "__main__":
    # Small shapes consistent with the module (hidden_size=256, intermediate_size=1024,
    # 8 tokens routed to this expert, hidden_act='silu').
    T, H, F = 8, 256, 1024

    key = jax.random.PRNGKey(0)
    kx, k1, k2, k3 = jax.random.split(key, 4)
    x = jax.random.normal(kx, (T, H), dtype=jnp.float32)
    # PyTorch nn.Linear weights are (out_features, in_features).
    w1 = jax.random.normal(k1, (F, H), dtype=jnp.float32) * 0.02
    w2 = jax.random.normal(k2, (H, F), dtype=jnp.float32) * 0.02
    w3 = jax.random.normal(k3, (F, H), dtype=jnp.float32) * 0.02

    # Reference mirroring the kernel's numerics (bf16 MXU inputs, f32 accumulation).
    w1b, w2b, w3b = (w.astype(jnp.bfloat16) for w in (w1, w2, w3))

    def ref_fn(xf):
        xb = xf.astype(jnp.bfloat16)
        g = jnp.dot(xb, w1b.T, preferred_element_type=jnp.float32)
        u = jnp.dot(xb, w3b.T, preferred_element_type=jnp.float32)
        h = (g * jax.nn.sigmoid(g)) * u
        return jnp.dot(h.astype(jnp.bfloat16), w2b.T, preferred_element_type=jnp.float32)

    ref = ref_fn(x)

    # 1) Decode-style call: tf=512 -> 2 ffn tiles -> 2-way F split, f32 output.
    w13_p, w2_p = pack_weights(w1, w2, w3, tf=512)
    out1 = jax.block_until_ready(mixtral_mlp(x, w13_p, w2_p))
    assert out1.shape == (T, H) and out1.dtype == jnp.float32
    assert jnp.allclose(out1, ref, atol=2e-3, rtol=2e-3), "f32 / split path mismatch"

    # 2) bf16 activations (scratch-accumulator path), auto-selected ffn tile.
    w13_a, w2_a = pack_weights(w1, w2, w3)
    out2 = jax.block_until_ready(mixtral_mlp(x.astype(jnp.bfloat16), w13_a, w2_a))
    assert out2.shape == (T, H) and out2.dtype == jnp.bfloat16
    assert jnp.allclose(out2.astype(jnp.float32), ref, atol=1e-2, rtol=1e-2), \
        "bf16-output path mismatch"

    # 3) Token tiling + padding path (T not a multiple of the token tile).
    T3 = 40
    x3 = jax.random.normal(jax.random.PRNGKey(1), (T3, H), dtype=jnp.float32)
    out3 = jax.block_until_ready(mixtral_mlp(x3, w13_p, w2_p, tt=16))
    assert out3.shape == (T3, H)
    assert jnp.allclose(out3, ref_fn(x3), atol=2e-3, rtol=2e-3), \
        "token-tiled / padded path mismatch"

    print("KERNEL_OK")
</pallas_src>

<mosaic_0001>
module attributes {stable_mosaic.version = 11 : i64} {
  func.func @_mlp_kernel(%arg0: i32, %arg1: i32, %arg2: i32, %arg3: memref<8x256xbf16, #tpu.memory_space<vmem>>, %arg4: memref<1x256x1024xbf16, #tpu.memory_space<vmem>>, %arg5: memref<1x512x256xbf16, #tpu.memory_space<vmem>>, %arg6: memref<1x8x256xf32, #tpu.memory_space<vmem>>) attributes {dimension_semantics = [#tpu.dimension_semantics<parallel>, #tpu.dimension_semantics<parallel>, #tpu.dimension_semantics<arbitrary>], iteration_bounds = array<i64: 2, 1, 1>, scalar_prefetch = 0 : i64, scratch_operands = 0 : i64, tpu.core_type = #tpu.core_type<tc>, window_params = [{transform_indices = @transform_0, window_bounds = array<i64: 8, 256>}, {transform_indices = @transform_1, window_bounds = array<i64: 1, 256, 1024>}, {transform_indices = @transform_2, window_bounds = array<i64: 1, 512, 256>}, {transform_indices = @transform_3, window_bounds = array<i64: 1, 8, 256>}]} {
    %c0 = arith.constant 0 : index
    %c0_0 = arith.constant 0 : index
    %0 = vector.load %arg3[%c0, %c0_0] : memref<8x256xbf16, #tpu.memory_space<vmem>>, vector<8x256xbf16>
    %c0_1 = arith.constant 0 : index
    %c0_2 = arith.constant 0 : index
    %c0_3 = arith.constant 0 : index
    %1 = vector.load %arg4[%c0_1, %c0_2, %c0_3] : memref<1x256x1024xbf16, #tpu.memory_space<vmem>>, vector<1x256x1024xbf16>
    %2 = vector.shape_cast %1 : vector<1x256x1024xbf16> to vector<256x1024xbf16>
    %cst = arith.constant dense<0.000000e+00> : vector<8x1024xf32>
    %3 = tpu.matmul %0, %2, %cst {dimension_numbers = #tpu.dot_dimension_numbers<[1], [0], [0], [1], [0, 0, 1, 1], [], []>} : vector<8x256xbf16>, vector<256x1024xbf16>, vector<8x1024xf32> -> vector<8x1024xf32>
    %4 = vector.extract_strided_slice %3 {offsets = [0, 0], sizes = [8, 512], strides = [1, 1]} : vector<8x1024xf32> to vector<8x512xf32>
    %5 = vector.extract_strided_slice %3 {offsets = [0, 512], sizes = [8, 512], strides = [1, 1]} : vector<8x1024xf32> to vector<8x512xf32>
    %6 = arith.negf %4 : vector<8x512xf32>
    %7 = math.exp %6 : vector<8x512xf32>
    %cst_4 = arith.constant 1.000000e+00 : f32
    %8 = vector.broadcast %cst_4 : f32 to vector<8x512xf32>
    %9 = arith.addf %8, %7 : vector<8x512xf32>
    %10 = arith.divf %8, %9 : vector<8x512xf32>
    %11 = arith.mulf %4, %10 : vector<8x512xf32>
    %12 = arith.mulf %11, %5 : vector<8x512xf32>
    %13 = arith.truncf %12 : vector<8x512xf32> to vector<8x512xbf16>
    %c0_5 = arith.constant 0 : index
    %c0_6 = arith.constant 0 : index
    %c0_7 = arith.constant 0 : index
    %14 = vector.load %arg5[%c0_5, %c0_6, %c0_7] : memref<1x512x256xbf16, #tpu.memory_space<vmem>>, vector<1x512x256xbf16>
    %15 = vector.shape_cast %14 : vector<1x512x256xbf16> to vector<512x256xbf16>
    %cst_8 = arith.constant dense<0.000000e+00> : vector<8x256xf32>
    %16 = tpu.matmul %13, %15, %cst_8 {dimension_numbers = #tpu.dot_dimension_numbers<[1], [0], [0], [1], [0, 0, 1, 1], [], []>} : vector<8x512xbf16>, vector<512x256xbf16>, vector<8x256xf32> -> vector<8x256xf32>
    %c0_i32 = arith.constant 0 : i32
    %17 = arith.cmpi eq, %arg2, %c0_i32 : i32
    %18 = arith.extui %17 : i1 to i32
    %c0_i32_9 = arith.constant 0 : i32
    %19 = arith.cmpi ne, %18, %c0_i32_9 : i32
    scf.if %19 {
      %c0_12 = arith.constant 0 : index
      %c0_13 = arith.constant 0 : index
      %c0_14 = arith.constant 0 : index
      %23 = vector.load %arg6[%c0_12, %c0_13, %c0_14] : memref<1x8x256xf32, #tpu.memory_space<vmem>>, vector<1x8x256xf32>
      %24 = vector.shape_cast %23 : vector<1x8x256xf32> to vector<8x256xf32>
      %25 = vector.shape_cast %16 : vector<8x256xf32> to vector<1x8x256xf32>
      tpu.vector_store %arg6[%c0_12, %c0_13, %c0_14], %25 {strides = array<i32>} : memref<1x8x256xf32, #tpu.memory_space<vmem>>, vector<1x8x256xf32>,
    } else {
    }
    %c0_i32_10 = arith.constant 0 : i32
    %20 = arith.cmpi sgt, %arg2, %c0_i32_10 : i32
    %21 = arith.extui %20 : i1 to i32
    %c0_i32_11 = arith.constant 0 : i32
    %22 = arith.cmpi ne, %21, %c0_i32_11 : i32
    scf.if %22 {
      %c0_12 = arith.constant 0 : index
      %c0_13 = arith.constant 0 : index
      %c0_14 = arith.constant 0 : index
      %23 = vector.load %arg6[%c0_12, %c0_13, %c0_14] : memref<1x8x256xf32, #tpu.memory_space<vmem>>, vector<1x8x256xf32>
      %24 = vector.shape_cast %23 : vector<1x8x256xf32> to vector<8x256xf32>
      %25 = arith.addf %24, %16 : vector<8x256xf32>
      %c0_15 = arith.constant 0 : index
      %c0_16 = arith.constant 0 : index
      %c0_17 = arith.constant 0 : index
      %26 = vector.load %arg6[%c0_15, %c0_16, %c0_17] : memref<1x8x256xf32, #tpu.memory_space<vmem>>, vector<1x8x256xf32>
      %27 = vector.shape_cast %26 : vector<1x8x256xf32> to vector<8x256xf32>
      %28 = vector.shape_cast %25 : vector<8x256xf32> to vector<1x8x256xf32>
      tpu.vector_store %arg6[%c0_15, %c0_16, %c0_17], %28 {strides = array<i32>} : memref<1x8x256xf32, #tpu.memory_space<vmem>>, vector<1x8x256xf32>,
    } else {
    }
    return
  }
  func.func @transform_0(%arg0: i32, %arg1: i32, %arg2: i32) -> (i32, i32) {
    %c0_i32 = arith.constant 0 : i32
    %c0_i32_0 = arith.constant 0 : i32
    return %arg1, %c0_i32 : i32, i32
  }
  func.func @transform_1(%arg0: i32, %arg1: i32, %arg2: i32) -> (i32, i32, i32) {
    %c1_i32 = arith.constant 1 : i32
    %0 = arith.muli %arg0, %c1_i32 : i32
    %1 = arith.addi %0, %arg2 : i32
    %c0_i32 = arith.constant 0 : i32
    %c0_i32_0 = arith.constant 0 : i32
    %c0_i32_1 = arith.constant 0 : i32
    return %1, %c0_i32, %c0_i32_0 : i32, i32, i32
  }
  func.func @transform_2(%arg0: i32, %arg1: i32, %arg2: i32) -> (i32, i32, i32) {
    %c1_i32 = arith.constant 1 : i32
    %0 = arith.muli %arg0, %c1_i32 : i32
    %1 = arith.addi %0, %arg2 : i32
    %c0_i32 = arith.constant 0 : i32
    %c0_i32_0 = arith.constant 0 : i32
    %c0_i32_1 = arith.constant 0 : i32
    return %1, %c0_i32, %c0_i32_0 : i32, i32, i32
  }
  func.func @transform_3(%arg0: i32, %arg1: i32, %arg2: i32) -> (i32, i32, i32) {
    %c0_i32 = arith.constant 0 : i32
    %c0_i32_0 = arith.constant 0 : i32
    return %arg0, %arg1, %c0_i32 : i32, i32, i32
  }
}

</mosaic_0001>

<bundles_post_ra>
// kernel: tpu_custom_call.1
= control target key start
LH: loop header
LB: loop body
LE: loop exit
PB: predicated region body
PF: predicated region fallthrough
CT: control target
= control target key end

     0   :  { %8 = vsyncpa [#allocation3], 0  ;;  %s3950_s0 = inlined_call_operand.hbm [shape: bf16[8,256], index: 0, kind: input, shape index: {}]   ;;  %s3951_s1 = inlined_call_operand.hbm [shape: bf16[2,256,1024], index: 1, kind: input, shape index: {}]   ;;  %s3952_s2 = inlined_call_operand.hbm [shape: bf16[2,512,256], index: 2, kind: input, shape index: {}]   ;;  %s3953_s3 = inlined_call_operand.hbm [shape: f32[2,8,256], index: 3, kind: output, shape index: {}]  }
   0x1   :  { %9 = vsyncpa [#allocation6], 0 }
   0x2   :  { %11 = vsyncpa [#allocation6 + $0x1], 0 }
   0x3   :  { %12 = vsyncpa [#allocation4], 0 }
   0x4   :  { %14 = vsyncpa [#allocation4 + $0x1], 0  ;;  %s3286_s12 = smov 0   ;;  %s3288_s13 = smov 0  }
   0x5   :  { %s3290_s14 = smov 0   ;;  %s3292_s15 = smov 0  }
   0x6   :  { %s3294_s16 = smov 0   ;;  %s3296_s17 = smov 0  }
   0x7 LB: > { %s39_s18 = sadd.s32 1, %s3255_s16  ;;  %s74_s19 = sadd.s32 1, %s3247_s14  ;;  %s3259_s17 = sphi %s3296_s17, %s20_s17   ;;  %s3255_s16 = sphi %s3294_s16, %s3968_s16   ;;  %s3251_s15 = sphi %s3292_s15, %s3967_s15   ;;  %s3247_s14 = sphi %s3290_s14, %s3966_s14   ;;  %s3243_s13 = sphi %s3288_s13, %s3965_s13   ;;  %s3239_s12 = sphi %s3286_s12, %s3964_s12  }
   0x8   : > { %p41_p0 = scmp.ge.s32.totalorder %s39_s18, 2  ;;  %p81_p1 = scmp.ne.s32.totalorder %s3247_s14, %s3243_s13 }
   0x9   : > { %p82_p2 = scmp.eq.s32.totalorder %s3259_s17, 0  ;;  %p2001_p3 = scmp.ge.s32.totalorder %s3259_s17, 2 }
   0xa   : > { %s3970_s18 = smov (%p41_p0, %s39_s18), 0  ;;  %p3011_p5 = scmp.lt.s32.totalorder %s3259_s17, 2 }
   0xb   : > { %p3327_p4 = por %p82_p2, %p81_p1  ;;  %s71_s21 = ssub.s32 %s3255_s16, %s3970_s18 }
   0xc   : > { %s182_s22 = sand.u32 1, %s3259_s17   ;;  %p72_p6 = scmp.eq.s32.totalorder %s71_s21, 0 }
   0xd   : > { %s184_s23 = sand.u32 1, %s3247_s14   ;;  %s2790_s24 = sshll.u32 %s3255_s16, 10 }
   0xe   : > { %s3338_s25 = scalar_select %p72_p6, %s3247_s14, %s74_s19  }
   0xf   : > { %s2002_s26 = sshll.u32 %s184_s23, 10  ;;  %s192_s29 = scalar_lea.hbm %s3951_s1, %s2790_s24 }
  0x10   : > { %s193_s30 = sshll.u32 %s192_s29, 4  ;;  %s186_s4 = scalar_lea.vmem [#allocation5], %s2002_s26  ;;  %s194_s30 = int_to_ptr.hbm [resolvable:$true] %s193_s30 }
  0x11   : > { %s195_s5 = sshll.u32 %s186_s4, 4  ;;  %p3347_p7 = pnand %p3011_p5, %p3327_p4  ;;  %s196_s5 = int_to_ptr.vmem [resolvable:$true] %s195_s5 }
  0x12   : > { %s2005_s7 = sshll.u32 %s184_s23, 9  ;;  %s3351_s8 = scalar_lea.sflag [#allocation6], %s182_s22 }
  0x13   : > { %s3261_s9 = smov 512   ;;  %s3262_s10 = smov 32  }
  0x14   : > { %3002 = dma.hbm_to_vmem [thread:$0]  (!%p3347_p7), %s194_s30, 16384, %s196_s5, %s3351_s8, %s3261_s9, %s3261_s9, %s3262_s10  }
  0x15   : > { %s209_s11 = scalar_lea.vmem [#allocation7], %s2005_s7  ;;  %s3359_s20 = sadd.s32 4294967295, %s3259_s17  }
  0x16   : > { %s3356_s19 = sshll.u32 %s209_s11, 4  ;;  %s1998_s21 = sadd.s32 4294967294, %s3259_s17   ;;  %s219_s19 = int_to_ptr.vmem [resolvable:$true] %s3356_s19 }
  0x17   : > { %p87_p8 = scmp.ne.s32.totalorder %s3243_s13, %s3239_s12  ;;  %p88_p9 = scmp.eq.s32.totalorder %s3359_s20, 0 }
  0x18   : > { %p141_p10 = scmp.eq.s32.totalorder %s3359_s20, 1  ;;  %p147_p11 = scmp.eq.s32.totalorder %s1998_s21, 1 }
  0x19   : > { %p3368_p12 = por %p88_p9, %p87_p8  ;;  %p1999_p13 = scmp.ge.s32.totalorder %s3259_s17, 1 }
  0x1a   : > { %p3376_p0 = por %p141_p10, %p81_p1  ;;  %p3380_p2 = por %p147_p11, %p87_p8 }
  0x1b   : > { %p154_p4 = scmp.lt.s32.totalorder %s3259_s17, 3  ;;  %s169_s28 = sshll.u32 %s3950_s0, 4  ;;  %s170_s28 = int_to_ptr.hbm [resolvable:$true] %s169_s28 }
  0x1c   : > { %s3263_s30 = smov [#allocation2]   ;;  %s2791_s5 = sshll.u32 %s3255_s16, 9 }
  0x1d   : > { %p3388_p5 = pnand %p1999_p13, %p154_p4  ;;  %s171_s4 = sshll.u32 %s3263_s30, 4  ;;  %s172_s4 = int_to_ptr.vmem [resolvable:$true] %s171_s4 }
  0x1e   : > { %s215_s10 = scalar_lea.hbm %s3952_s2, %s2791_s5  ;;  %s3264_s21 = smov 128  }
  0x1f   : > { %p2995_p1 = pneg %p3388_p5  ;;  %s216_s11 = sshll.u32 %s215_s10, 4  ;;  %s217_s11 = int_to_ptr.hbm [resolvable:$true] %s216_s11 }
  0x20   : > { %s3265_s26 = smov 8   ;;  %230 = sbr.rel (%p3388_p5) target bundleno = 469 (0x1d5), region = 32 }
  0x21   : > { %p2996_p6 = pnand %p2995_p1, %p88_p9 }
  0x22   : > { %3005 = dma.hbm_to_vmem [thread:$0]  (!%p3347_p7), %s217_s11, 8192, %s219_s19, %s3351_s8, %s3264_s21, %s3264_s21, %s3265_s26  }
  0x23   : > { %2998 = dma.hbm_to_vmem [thread:$0]  (!%p2996_p6), %s170_s28, 128, %s172_s4, [#allocation3]  }
  0x25   : > { %3226 = dma.done.wait (%p88_p9), [#allocation3], 128  }
  0x26   : > { %3228 = vsyncadd (%p88_p9), [#allocation3], 4294967168  ;;  %s237_s27 = sand.u32 1, %s3359_s20   ;;  %s3412_s30 = sand.u32 1, %s3243_s13  }
  0x27   : > { %s2010_s28 = sshll.u32 %s3412_s30, 10  ;;  %s238_s4 = scalar_lea.sflag [#allocation6], %s237_s27 }
  0x28   : > { %s3415_s6 = scalar_lea.vmem [#allocation5], %s2010_s28 }
  0x29   : > { %3230 = dma.done.wait (%p3368_p12), %s238_s4, 24576  }
  0x2a   : > { %3232 = vsyncadd (%p3368_p12), %s238_s4, 4294942720  ;;  %v2239_v0 = vld [vmem:[%s3415_s6 + $0x1c0] sm:$0xf]  ;;  %v2848_v5 = vld [vmem:[%s3415_s6 + $0x1c4] sm:$0xf]  ;;  %s2011_s8 = sshll.u32 %s3412_s30, 9 }
  0x2b   : > { %v2852_v1 = vld [vmem:[%s3415_s6 + $0x1dc] sm:$0xf0]  ;;  %v2241_v6 = vld [vmem:[%s3415_s6 + $0x1e0] sm:$0xf0]  ;;  %s3698_s19 = scalar_lea.vmem [#allocation7], %s2011_s8  ;;  %s2012_s20 = sshll.u32 %s3412_s30, 4 }
  0x2c   : > { %v2495_v2 = vld [vmem:[%s3415_s6 + $0x3c0] sm:$0xf]  ;;  %v2240_v3 = vor.u32 %v2852_v1, %v2239_v0  ;;  %v2244_v8 = vor.u32 %v2848_v5, %v2241_v6  ;;  %v2912_v9 = vld [vmem:[%s3415_s6 + $0x3c4] sm:$0xf]  ;;  %s279_s22 = scalar_lea.vmem [#allocation8], %s2012_s20  ;;  %s2984_s29 = sshll.u32 %s3251_s15, 4 }
  0x2d   : > { %v2916_v4 = vld [vmem:[%s3415_s6 + $0x3dc] sm:$0xf0]  ;;  %v2497_v10 = vld [vmem:[%s3415_s6 + $0x3e0] sm:$0xf0]  ;;  %s1872_s9 = scalar_lea.hbm %s3953_s3, %s2984_s29  ;;  %s1874_s10 = sshll.u32 %s279_s22, 4  ;;  %s1875_s10 = int_to_ptr.vmem [resolvable:$true] %s1874_s10 }
  0x2e   : > { %v2496_v7 = vor.u32 %v2916_v4, %v2495_v2  ;;  %v2207_v11 = vld [vmem:[%s3415_s6 + $0x180] sm:$0xf]  ;;  %1058 = vmatpush.bf16.msra.mxu0 %v2240_v3  ;;  %v2500_v12 = vor.u32 %v2912_v9, %v2497_v10  ;;  %1084 = vmatpush.bf16.msra.mxu2 %v2244_v8  ;;  %v2840_v18 = vld [vmem:[%s3415_s6 + $0x184] sm:$0xf]  ;;  %s1876_s11 = sshll.u32 %s1872_s9, 4  ;;  %s1859_s21 = scalar_lea.sflag [#allocation4], %s3412_s30  ;;  %s1877_s11 = int_to_ptr.hbm [resolvable:$true] %s1876_s11 }
  0x2f   : > { %v2844_v13 = vld [vmem:[%s3415_s6 + $0x19c] sm:$0xf0]  ;;  %v2209_v19 = vld [vmem:[%s3415_s6 + $0x1a0] sm:$0xf0]  ;;  %s3187_s26 = sshra.s32 %s1877_s11, 4  ;;  %s3193_s4 = scalar_lea.hbm %s3953_s3, 32  ;;  %s3188_s26 = int_to_ptr.hbm [resolvable:$true] %s3187_s26 }
  0x30   : > { %v2463_v14 = vld [vmem:[%s3415_s6 + $0x380] sm:$0xf]  ;;  %1071 = vmatpush.bf16.msra.mxu1 %v2496_v7  ;;  %v2208_v16 = vor.u32 %v2844_v13, %v2207_v11  ;;  %v2904_v20 = vld [vmem:[%s3415_s6 + $0x384] sm:$0xf]  ;;  %1097 = vmatpush.bf16.msra.mxu3 %v2500_v12  ;;  %v2212_v21 = vor.u32 %v2840_v18, %v2209_v19  ;;  %s3189_s15 = scalar_lea.hbm %s3188_s26, 16  ;;  %p3194_p10 = scmp.lt.s32.totalorder %s3188_s26, %s3953_s3 }
  0x31   : > { %v2908_v15 = vld [vmem:[%s3415_s6 + $0x39c] sm:$0xf0]  ;;  %v2465_v22 = vld [vmem:[%s3415_s6 + $0x3a0] sm:$0xf0]  ;;  %p3190_p7 = scmp.ne.s32.totalorder %s3188_s26, %s3189_s15  ;;  %p3195_p11 = scmp.lt.s32.totalorder %s3193_s4, %s3189_s15 }
  0x32   : > { %v2464_v17 = vor.u32 %v2908_v15, %v2463_v14  ;;  %v2175_v23 = vld [vmem:[%s3415_s6 + $0x140] sm:$0xf]  ;;  %v2468_v25 = vor.u32 %v2904_v20, %v2465_v22  ;;  %v2832_v28 = vld [vmem:[%s3415_s6 + $0x144] sm:$0xf]  ;;  %1059 = vmatpush.bf16.msra.mxu0 %v2208_v16  ;;  %1085 = vmatpush.bf16.msra.mxu2 %v2212_v21 }
  0x33   : > { %v2836_v24 = vld [vmem:[%s3415_s6 + $0x15c] sm:$0xf0]  ;;  %v2177_v30 = vld [vmem:[%s3415_s6 + $0x160] sm:$0xf0]  ;;  %p3191_p8 = pnand %p3190_p7, %p3376_p0  ;;  %p3196_p12 = por %p3195_p11, %p3194_p10 }
  0x34   : > { %v2431_v26 = vld [vmem:[%s3415_s6 + $0x340] sm:$0xf]  ;;  %v2176_v29 = vor.u32 %v2836_v24, %v2175_v23  ;;  %v2896_v31 = vld [vmem:[%s3415_s6 + $0x344] sm:$0xf]  ;;  %1072 = vmatpush.bf16.msra.mxu1 %v2464_v17  ;;  %v2180_v34 = vor.u32 %v2832_v28, %v2177_v30  ;;  %1098 = vmatpush.bf16.msra.mxu3 %v2468_v25  ;;  %v282_v24 = vld [vmem:[#allocation2] sm:$0xff] }
  0x35   : > { %v2900_v27 = vld [vmem:[%s3415_s6 + $0x35c] sm:$0xf0]  ;;  %v2433_v32 = vld [vmem:[%s3415_s6 + $0x360] sm:$0xf0]  ;;  %v2853_v30 = vld [vmem:[%s3415_s6 + $0x1e4] sm:$0xf0]  ;;  %p3192_p9 = pneg %p3191_p8 }
  0x36   : > { %v2432_v33 = vor.u32 %v2900_v27, %v2431_v26  ;;  %v2143_v35 = vld [vmem:[%s3415_s6 + $0x100] sm:$0xf]  ;;  %v2436_v38 = vor.u32 %v2896_v31, %v2433_v32  ;;  %v2824_v40 = vld [vmem:[%s3415_s6 + $0x104] sm:$0xf]  ;;  %1060 = vmatpush.bf16.msra.mxu0 %v2176_v29  ;;  %1086 = vmatpush.bf16.msra.mxu2 %v2180_v34  ;;  %v2247_v29 = vld [vmem:[%s3415_s6 + $0x1c8] sm:$0xf] }
  0x37   : > { %v2828_v36 = vld [vmem:[%s3415_s6 + $0x11c] sm:$0xf0]  ;;  %v2145_v41 = vld [vmem:[%s3415_s6 + $0x120] sm:$0xf0]  ;;  %v2503_v31 = vld [vmem:[%s3415_s6 + $0x3c8] sm:$0xf]  ;;  %p3197_p13 = pnand %p3196_p12, %p3192_p9 }
  0x38   : > { %v2399_v37 = vld [vmem:[%s3415_s6 + $0x300] sm:$0xf]  ;;  %v2888_v42 = vld [vmem:[%s3415_s6 + $0x304] sm:$0xf]  ;;  %v2144_v44 = vor.u32 %v2828_v36, %v2143_v35  ;;  %1073 = vmatpush.bf16.msra.mxu1 %v2432_v33  ;;  %v2148_v46 = vor.u32 %v2824_v40, %v2145_v41  ;;  %1099 = vmatpush.bf16.msra.mxu3 %v2436_v38  ;;  %v2917_v33 = vld [vmem:[%s3415_s6 + $0x3e4] sm:$0xf0]  ;;  %v412_v36 = vunpack.c.l.b16 %v282_v24  ;;  %v413_v41 = vunpack.c.h.b16 %v282_v24 }
  0x39   : > { %v2892_v39 = vld [vmem:[%s3415_s6 + $0x31c] sm:$0xf0]  ;;  %v2401_v43 = vld [vmem:[%s3415_s6 + $0x320] sm:$0xf0]  ;;  %v2849_v34 = vld [vmem:[%s3415_s6 + $0x1cc] sm:$0xf] }
  0x3a   : > { %v2400_v45 = vor.u32 %v2892_v39, %v2399_v37  ;;  %v2111_v47 = vld [vmem:[%s3415_s6 + $0xc0] sm:$0xf]  ;;  %v2404_v50 = vor.u32 %v2888_v42, %v2401_v43  ;;  %v2816_v52 = vld [vmem:[%s3415_s6 + $0xc4] sm:$0xf]  ;;  %1061 = vmatpush.bf16.msra.mxu0 %v2144_v44  ;;  %1087 = vmatpush.bf16.msra.mxu2 %v2148_v46  ;;  %v2249_v35 = vld [vmem:[%s3415_s6 + $0x1e8] sm:$0xf0]  ;;  %v2248_v43 = vor.u32 %v2853_v30, %v2247_v29 }
  0x3b   : > { %v2820_v48 = vld [vmem:[%s3415_s6 + $0xdc] sm:$0xf0]  ;;  %v2113_v53 = vld [vmem:[%s3415_s6 + $0xe0] sm:$0xf0]  ;;  %v2913_v39 = vld [vmem:[%s3415_s6 + $0x3cc] sm:$0xf]  ;;  %v2504_v44 = vor.u32 %v2917_v33, %v2503_v31 }
  0x3c   : > { %v2367_v49 = vld [vmem:[%s3415_s6 + $0x2c0] sm:$0xf]  ;;  %v2880_v54 = vld [vmem:[%s3415_s6 + $0x2c4] sm:$0xf]  ;;  %v2112_v56 = vor.u32 %v2820_v48, %v2111_v47  ;;  %1074 = vmatpush.bf16.msra.mxu1 %v2400_v45  ;;  %v2116_v58 = vor.u32 %v2816_v52, %v2113_v53  ;;  %1100 = vmatpush.bf16.msra.mxu3 %v2404_v50  ;;  %v2505_v40 = vld [vmem:[%s3415_s6 + $0x3e8] sm:$0xf0]  ;;  %v2252_v45 = vor.u32 %v2849_v34, %v2249_v35 }
  0x3d   : > { %v2884_v51 = vld [vmem:[%s3415_s6 + $0x2dc] sm:$0xf0]  ;;  %v2369_v55 = vld [vmem:[%s3415_s6 + $0x2e0] sm:$0xf0]  ;;  %v2215_v46 = vld [vmem:[%s3415_s6 + $0x188] sm:$0xf]  ;;  %v3496_v50 = vpack.c.b16 %v412_v36, %v412_v36 }
  0x3e   : > { %v2368_v57 = vor.u32 %v2884_v51, %v2367_v49  ;;  %v2079_v59 = vld [vmem:[%s3415_s6 + $0x80] sm:$0xf]  ;;  %v2372_v62 = vor.u32 %v2880_v54, %v2369_v55  ;;  %v2808_v0 = vld [vmem:[%s3415_s6 + $0x84] sm:$0xf]  ;;  %1062 = vmatpush.bf16.msra.mxu0 %v2112_v56  ;;  %1088 = vmatpush.bf16.msra.mxu2 %v2116_v58  ;;  %v2845_v47 = vld [vmem:[%s3415_s6 + $0x1a4] sm:$0xf0]  ;;  %v2508_v49 = vor.u32 %v2913_v39, %v2505_v40 }
  0x3f   : > { %v2812_v60 = vld [vmem:[%s3415_s6 + $0x9c] sm:$0xf0]  ;;  %v2081_v1 = vld [vmem:[%s3415_s6 + $0xa0] sm:$0xf0]  ;;  %v2471_v48 = vld [vmem:[%s3415_s6 + $0x388] sm:$0xf]  ;;  %v3501_v54 = vpack.c.b16 %v413_v41, %v413_v41 }
  0x40   : > { %v2335_v61 = vld [vmem:[%s3415_s6 + $0x280] sm:$0xf]  ;;  %v2872_v2 = vld [vmem:[%s3415_s6 + $0x284] sm:$0xf]  ;;  %v2080_v4 = vor.u32 %v2812_v60, %v2079_v59  ;;  %1075 = vmatpush.bf16.msra.mxu1 %v2368_v57  ;;  %v2084_v6 = vor.u32 %v2808_v0, %v2081_v1  ;;  %1101 = vmatpush.bf16.msra.mxu3 %v2372_v62  ;;  %v2909_v51 = vld [vmem:[%s3415_s6 + $0x3a4] sm:$0xf0]  ;;  %v2216_v57 = vor.u32 %v2845_v47, %v2215_v46 }
  0x41   : > { %v2876_v63 = vld [vmem:[%s3415_s6 + $0x29c] sm:$0xf0]  ;;  %v2337_v3 = vld [vmem:[%s3415_s6 + $0x2a0] sm:$0xf0]  ;;  %v2841_v52 = vld [vmem:[%s3415_s6 + $0x18c] sm:$0xf]  ;;  %v2472_v58 = vor.u32 %v2909_v51, %v2471_v48 }
  0x42   : > { %v2336_v5 = vor.u32 %v2876_v63, %v2335_v61  ;;  %v2047_v7 = vld [vmem:[%s3415_s6 + $0x40] sm:$0xf]  ;;  %v2340_v10 = vor.u32 %v2872_v2, %v2337_v3  ;;  %v2800_v12 = vld [vmem:[%s3415_s6 + $0x44] sm:$0xf]  ;;  %1063 = vmatpush.bf16.msra.mxu0 %v2080_v4  ;;  %1089 = vmatpush.bf16.msra.mxu2 %v2084_v6  ;;  %v2217_v53 = vld [vmem:[%s3415_s6 + $0x1a8] sm:$0xf0] }
  0x43   : > { %v2804_v8 = vld [vmem:[%s3415_s6 + $0x5c] sm:$0xf0]  ;;  %v2049_v13 = vld [vmem:[%s3415_s6 + $0x60] sm:$0xf0]  ;;  %v2905_v55 = vld [vmem:[%s3415_s6 + $0x38c] sm:$0xf]  ;;  %v2220_v59 = vor.u32 %v2841_v52, %v2217_v53 }
  0x44   : > { %v2303_v9 = vld [vmem:[%s3415_s6 + $0x240] sm:$0xf]  ;;  %v2864_v14 = vld [vmem:[%s3415_s6 + $0x244] sm:$0xf]  ;;  %v2048_v16 = vor.u32 %v2804_v8, %v2047_v7  ;;  %1076 = vmatpush.bf16.msra.mxu1 %v2336_v5  ;;  %v2052_v21 = vor.u32 %v2800_v12, %v2049_v13  ;;  %1102 = vmatpush.bf16.msra.mxu3 %v2340_v10  ;;  %v2473_v56 = vld [vmem:[%s3415_s6 + $0x3a8] sm:$0xf0] }
  0x45   : > { %v2868_v11 = vld [vmem:[%s3415_s6 + $0x25c] sm:$0xf0]  ;;  %v2305_v15 = vld [vmem:[%s3415_s6 + $0x260] sm:$0xf0]  ;;  %v2183_v60 = vld [vmem:[%s3415_s6 + $0x148] sm:$0xf]  ;;  %v2476_v63 = vor.u32 %v2905_v55, %v2473_v56 }
  0x46   : > { %v2015_v17 = vld [vmem:[%s3415_s6] sm:$0xf]  ;;  %v2304_v20 = vor.u32 %v2868_v11, %v2303_v9  ;;  %v2792_v23 = vld [vmem:[%s3415_s6 + $0x4] sm:$0xf]  ;;  %v2308_v25 = vor.u32 %v2864_v14, %v2305_v15  ;;  %1064 = vmatpush.bf16.msra.mxu0 %v2048_v16  ;;  %1090 = vmatpush.bf16.msra.mxu2 %v2052_v21  ;;  %v2837_v61 = vld [vmem:[%s3415_s6 + $0x164] sm:$0xf0] }
  0x47   : > { %v2796_v18 = vld [vmem:[%s3415_s6 + $0x1c] sm:$0xf0]  ;;  %v2017_v26 = vld [vmem:[%s3415_s6 + $0x20] sm:$0xf0]  ;;  %v2439_v62 = vld [vmem:[%s3415_s6 + $0x348] sm:$0xf]  ;;  %v2184_v5 = vor.u32 %v2837_v61, %v2183_v60 }
  0x48   : > { %v2271_v19 = vld [vmem:[%s3415_s6 + $0x200] sm:$0xf]  ;;  %v2856_v27 = vld [vmem:[%s3415_s6 + $0x204] sm:$0xf]  ;;  %v2016_v32 = vor.u32 %v2796_v18, %v2015_v17  ;;  %1077 = vmatpush.bf16.msra.mxu1 %v2304_v20  ;;  %v2020_v38 = vor.u32 %v2792_v23, %v2017_v26  ;;  %1103 = vmatpush.bf16.msra.mxu3 %v2308_v25  ;;  %v2901_v0 = vld [vmem:[%s3415_s6 + $0x364] sm:$0xf0] }
  0x49   : > { %v2860_v22 = vld [vmem:[%s3415_s6 + $0x21c] sm:$0xf0]  ;;  %v2273_v28 = vld [vmem:[%s3415_s6 + $0x220] sm:$0xf0]  ;;  %v2833_v1 = vld [vmem:[%s3415_s6 + $0x14c] sm:$0xf]  ;;  %v2440_v6 = vor.u32 %v2901_v0, %v2439_v62 }
  0x4a   : > { %v2272_v37 = vor.u32 %v2860_v22, %v2271_v19  ;;  %v2276_v42 = vor.u32 %v2856_v27, %v2273_v28  ;;  %1065 = vmatpush.bf16.msra.mxu0 %v2016_v32  ;;  %1091 = vmatpush.bf16.msra.mxu2 %v2020_v38  ;;  %v2185_v2 = vld [vmem:[%s3415_s6 + $0x168] sm:$0xf0]  ;;  %v2151_v8 = vld [vmem:[%s3415_s6 + $0x108] sm:$0xf] }
  0x4b   : > { %v2897_v3 = vld [vmem:[%s3415_s6 + $0x34c] sm:$0xf]  ;;  %v2188_v7 = vor.u32 %v2833_v1, %v2185_v2  ;;  %v2829_v9 = vld [vmem:[%s3415_s6 + $0x124] sm:$0xf0] }
  0x4c   : > { %1078 = vmatpush.bf16.msra.mxu1 %v2272_v37  ;;  %1104 = vmatpush.bf16.msra.mxu3 %v2276_v42  ;;  %v2441_v4 = vld [vmem:[%s3415_s6 + $0x368] sm:$0xf0]  ;;  %v2407_v10 = vld [vmem:[%s3415_s6 + $0x308] sm:$0xf]  ;;  %v2152_v17 = vor.u32 %v2829_v9, %v2151_v8  ;;  %v2850_v8 = vld [vmem:[%s3415_s6 + $0x1d4] sm:$0xf] }
  0x4d   : > { %1092 = vmatmul.bf16.vlgmr.msra.gmra.mxu2 %v3496_v50  ;;  %1066 = vmatmul.bf16.vlgmr.msra.gmra.mxu0 %v3496_v50  ;;  %v2444_v11 = vor.u32 %v2897_v3, %v2441_v4  ;;  %v2893_v12 = vld [vmem:[%s3415_s6 + $0x324] sm:$0xf0]  ;;  %v2825_v13 = vld [vmem:[%s3415_s6 + $0x10c] sm:$0xf]  ;;  %v2255_v3 = vld [vmem:[%s3415_s6 + $0x1d0] sm:$0xf] }
  0x4e   : > { %1110 = vmatpush.bf16.msrb.mxu0 %v2248_v43  ;;  %1136 = vmatpush.bf16.msrb.mxu2 %v2252_v45  ;;  %v2153_v14 = vld [vmem:[%s3415_s6 + $0x128] sm:$0xf0]  ;;  %v2408_v18 = vor.u32 %v2893_v12, %v2407_v10  ;;  %v2119_v20 = vld [vmem:[%s3415_s6 + $0xc8] sm:$0xf]  ;;  %v2854_v4 = vld [vmem:[%s3415_s6 + $0x1ec] sm:$0xf0] }
  0x4f   : > { %1105 = vmatmul.bf16.vlgmr.msra.gmra.mxu3 %v3501_v54  ;;  %1079 = vmatmul.bf16.vlgmr.msra.gmra.mxu1 %v3501_v54  ;;  %v2889_v15 = vld [vmem:[%s3415_s6 + $0x30c] sm:$0xf]  ;;  %v2156_v19 = vor.u32 %v2825_v13, %v2153_v14  ;;  %v2821_v21 = vld [vmem:[%s3415_s6 + $0xe4] sm:$0xf0]  ;;  %v2257_v9 = vld [vmem:[%s3415_s6 + $0x1f0] sm:$0xf0] }
  0x50   : > { %1123 = vmatpush.bf16.msrb.mxu1 %v2504_v44  ;;  %1149 = vmatpush.bf16.msrb.mxu3 %v2508_v49  ;;  %v2409_v16 = vld [vmem:[%s3415_s6 + $0x328] sm:$0xf0]  ;;  %v2375_v22 = vld [vmem:[%s3415_s6 + $0x2c8] sm:$0xf]  ;;  %v2120_v29 = vor.u32 %v2821_v21, %v2119_v20  ;;  %v2914_v12 = vld [vmem:[%s3415_s6 + $0x3d4] sm:$0xf] }
  0x51   : > { %v2412_v23 = vor.u32 %v2889_v15, %v2409_v16  ;;  %v2885_v24 = vld [vmem:[%s3415_s6 + $0x2e4] sm:$0xf0]  ;;  %v2817_v25 = vld [vmem:[%s3415_s6 + $0xcc] sm:$0xf]  ;;  %v2513_v13 = vld [vmem:[%s3415_s6 + $0x3f0] sm:$0xf0]  ;;  %v2256_v15 = vor.u32 %v2854_v4, %v2255_v3 }
  0x52   : > { %1111 = vmatpush.bf16.msrb.mxu0 %v2216_v57  ;;  %1137 = vmatpush.bf16.msrb.mxu2 %v2220_v59  ;;  %v2121_v26 = vld [vmem:[%s3415_s6 + $0xe8] sm:$0xf0]  ;;  %v2376_v30 = vor.u32 %v2885_v24, %v2375_v22  ;;  %v2087_v32 = vld [vmem:[%s3415_s6 + $0x88] sm:$0xf]  ;;  %v2479_v20 = vld [vmem:[%s3415_s6 + $0x390] sm:$0xf]  ;;  %v2516_v21 = vor.u32 %v2914_v12, %v2513_v13 }
  0x53   : > { %v2881_v27 = vld [vmem:[%s3415_s6 + $0x2cc] sm:$0xf]  ;;  %v2124_v31 = vor.u32 %v2817_v25, %v2121_v26  ;;  %v2813_v33 = vld [vmem:[%s3415_s6 + $0xa4] sm:$0xf0]  ;;  %v2910_v22 = vld [vmem:[%s3415_s6 + $0x3ac] sm:$0xf0] }
  0x54   : > { %1124 = vmatpush.bf16.msrb.mxu1 %v2472_v58  ;;  %1150 = vmatpush.bf16.msrb.mxu3 %v2476_v63  ;;  %v2377_v28 = vld [vmem:[%s3415_s6 + $0x2e8] sm:$0xf0]  ;;  %v2343_v34 = vld [vmem:[%s3415_s6 + $0x288] sm:$0xf]  ;;  %v2088_v41 = vor.u32 %v2813_v33, %v2087_v32  ;;  %v2225_v24 = vld [vmem:[%s3415_s6 + $0x1b0] sm:$0xf0] }
  0x55   : > { %v2380_v35 = vor.u32 %v2881_v27, %v2377_v28  ;;  %v2877_v36 = vld [vmem:[%s3415_s6 + $0x2a4] sm:$0xf0]  ;;  %v2809_v37 = vld [vmem:[%s3415_s6 + $0x8c] sm:$0xf]  ;;  %v2906_v25 = vld [vmem:[%s3415_s6 + $0x394] sm:$0xf]  ;;  %v2480_v28 = vor.u32 %v2910_v22, %v2479_v20 }
  0x56   : > { %1112 = vmatpush.bf16.msrb.mxu0 %v2184_v5  ;;  %1138 = vmatpush.bf16.msrb.mxu2 %v2188_v7  ;;  %v2089_v38 = vld [vmem:[%s3415_s6 + $0xa8] sm:$0xf0]  ;;  %v2344_v42 = vor.u32 %v2877_v36, %v2343_v34  ;;  %v2055_v44 = vld [vmem:[%s3415_s6 + $0x48] sm:$0xf]  ;;  %v2511_v5 = vld [vmem:[%s3415_s6 + $0x3d0] sm:$0xf] }
  0x57   : > { %v2873_v39 = vld [vmem:[%s3415_s6 + $0x28c] sm:$0xf]  ;;  %v2092_v43 = vor.u32 %v2809_v37, %v2089_v38  ;;  %v2805_v45 = vld [vmem:[%s3415_s6 + $0x64] sm:$0xf0]  ;;  %v2918_v7 = vld [vmem:[%s3415_s6 + $0x3ec] sm:$0xf0] }
  0x58   : > { %1125 = vmatpush.bf16.msrb.mxu1 %v2440_v6  ;;  %1151 = vmatpush.bf16.msrb.mxu3 %v2444_v11  ;;  %v2345_v40 = vld [vmem:[%s3415_s6 + $0x2a8] sm:$0xf0]  ;;  %v2311_v46 = vld [vmem:[%s3415_s6 + $0x248] sm:$0xf]  ;;  %v2056_v55 = vor.u32 %v2805_v45, %v2055_v44  ;;  %v2512_v16 = vor.u32 %v2918_v7, %v2511_v5  ;;  %v2481_v26 = vld [vmem:[%s3415_s6 + $0x3b0] sm:$0xf0] }
  0x59   : > { %v2348_v47 = vor.u32 %v2873_v39, %v2345_v40  ;;  %v2869_v48 = vld [vmem:[%s3415_s6 + $0x264] sm:$0xf0]  ;;  %v2801_v49 = vld [vmem:[%s3415_s6 + $0x4c] sm:$0xf]  ;;  %v2447_v32 = vld [vmem:[%s3415_s6 + $0x350] sm:$0xf]  ;;  %v2484_v33 = vor.u32 %v2906_v25, %v2481_v26 }
  0x5a   : > { %1113 = vmatpush.bf16.msrb.mxu0 %v2152_v17  ;;  %1139 = vmatpush.bf16.msrb.mxu2 %v2156_v19  ;;  %v2057_v51 = vld [vmem:[%s3415_s6 + $0x68] sm:$0xf0]  ;;  %v2023_v56 = vld [vmem:[%s3415_s6 + $0x8] sm:$0xf]  ;;  %v2312_v58 = vor.u32 %v2869_v48, %v2311_v46  ;;  %v2260_v17 = vor.u32 %v2850_v8, %v2257_v9  ;;  %v2846_v19 = vld [vmem:[%s3415_s6 + $0x1ac] sm:$0xf0] }
  0x5b   : > { %v2865_v52 = vld [vmem:[%s3415_s6 + $0x24c] sm:$0xf]  ;;  %v2797_v57 = vld [vmem:[%s3415_s6 + $0x24] sm:$0xf0]  ;;  %v2060_v59 = vor.u32 %v2801_v49, %v2057_v51  ;;  %v2902_v34 = vld [vmem:[%s3415_s6 + $0x36c] sm:$0xf0] }
  0x5c   : > { %1126 = vmatpush.bf16.msrb.mxu1 %v2408_v18  ;;  %1152 = vmatpush.bf16.msrb.mxu3 %v2412_v23  ;;  %v2313_v53 = vld [vmem:[%s3415_s6 + $0x268] sm:$0xf0]  ;;  %v2279_v60 = vld [vmem:[%s3415_s6 + $0x208] sm:$0xf]  ;;  %v2024_v6 = vor.u32 %v2797_v57, %v2023_v56  ;;  %v2223_v18 = vld [vmem:[%s3415_s6 + $0x190] sm:$0xf]  ;;  %v2448_v40 = vor.u32 %v2902_v34, %v2447_v32 }
  0x5d   : > { %v2861_v61 = vld [vmem:[%s3415_s6 + $0x224] sm:$0xf0]  ;;  %v2793_v62 = vld [vmem:[%s3415_s6 + $0xc] sm:$0xf]  ;;  %v2316_v63 = vor.u32 %v2865_v52, %v2313_v53  ;;  %v2842_v23 = vld [vmem:[%s3415_s6 + $0x194] sm:$0xf]  ;;  %v2224_v27 = vor.u32 %v2846_v19, %v2223_v18 }
  0x5e   : > { %1114 = vmatpush.bf16.msrb.mxu0 %v2120_v29  ;;  %1140 = vmatpush.bf16.msrb.mxu2 %v2124_v31  ;;  %v2025_v0 = vld [vmem:[%s3415_s6 + $0x28] sm:$0xf0]  ;;  %v2280_v10 = vor.u32 %v2861_v61, %v2279_v60  ;;  %v2228_v29 = vor.u32 %v2842_v23, %v2225_v24  ;;  %v2838_v31 = vld [vmem:[%s3415_s6 + $0x16c] sm:$0xf0]  ;;  %v2193_v36 = vld [vmem:[%s3415_s6 + $0x170] sm:$0xf0] }
  0x5f   : > { %v2857_v1 = vld [vmem:[%s3415_s6 + $0x20c] sm:$0xf]  ;;  %v2028_v11 = vor.u32 %v2793_v62, %v2025_v0  ;;  %v2898_v37 = vld [vmem:[%s3415_s6 + $0x354] sm:$0xf]  ;;  %v2415_v44 = vld [vmem:[%s3415_s6 + $0x310] sm:$0xf] }
  0x60   : > { %1127 = vmatpush.bf16.msrb.mxu1 %v2376_v30  ;;  %1153 = vmatpush.bf16.msrb.mxu3 %v2380_v35  ;;  %v2281_v2 = vld [vmem:[%s3415_s6 + $0x228] sm:$0xf0]  ;;  %v2191_v30 = vld [vmem:[%s3415_s6 + $0x150] sm:$0xf]  ;;  %v2834_v35 = vld [vmem:[%s3415_s6 + $0x154] sm:$0xf] }
  0x61   : > { %v2284_v14 = vor.u32 %v2857_v1, %v2281_v2  ;;  %v2449_v38 = vld [vmem:[%s3415_s6 + $0x370] sm:$0xf0]  ;;  %v2192_v39 = vor.u32 %v2838_v31, %v2191_v30  ;;  %v2894_v46 = vld [vmem:[%s3415_s6 + $0x32c] sm:$0xf0] }
  0x62   : > { %1115 = vmatpush.bf16.msrb.mxu0 %v2088_v41  ;;  %1141 = vmatpush.bf16.msrb.mxu2 %v2092_v43  ;;  %v2196_v41 = vor.u32 %v2834_v35, %v2193_v36  ;;  %v2830_v43 = vld [vmem:[%s3415_s6 + $0x12c] sm:$0xf0]  ;;  %v2452_v45 = vor.u32 %v2898_v37, %v2449_v38  ;;  %v2161_v48 = vld [vmem:[%s3415_s6 + $0x130] sm:$0xf0]  ;;  %v2416_v53 = vor.u32 %v2894_v46, %v2415_v44  ;;  %v2263_v37 = vld [vmem:[%s3415_s6 + $0x1d8] sm:$0xf] }
  0x63   : > { %v2890_v49 = vld [vmem:[%s3415_s6 + $0x314] sm:$0xf]  ;;  %v2127_v56 = vld [vmem:[%s3415_s6 + $0xd0] sm:$0xf]  ;;  %v2855_v38 = vld [vmem:[%s3415_s6 + $0x1f4] sm:$0xf0] }
  0x64   : > { %1128 = vmatpush.bf16.msrb.mxu1 %v2344_v42  ;;  %1154 = vmatpush.bf16.msrb.mxu3 %v2348_v47  ;;  %v2159_v42 = vld [vmem:[%s3415_s6 + $0x110] sm:$0xf]  ;;  %v2826_v47 = vld [vmem:[%s3415_s6 + $0x114] sm:$0xf]  ;;  %v2915_v46 = vld [vmem:[%s3415_s6 + $0x3dc] sm:$0xf] }
  0x65   : > { %v2417_v51 = vld [vmem:[%s3415_s6 + $0x330] sm:$0xf0]  ;;  %v2160_v52 = vor.u32 %v2830_v43, %v2159_v42  ;;  %v2822_v57 = vld [vmem:[%s3415_s6 + $0xec] sm:$0xf0]  ;;  %v2851_v42 = vld [vmem:[%s3415_s6 + $0x1dc] sm:$0xf] }
  0x66   : > { %1116 = vmatpush.bf16.msrb.mxu0 %v2056_v55  ;;  %1142 = vmatpush.bf16.msrb.mxu2 %v2060_v59  ;;  %v2164_v55 = vor.u32 %v2826_v47, %v2161_v48  ;;  %v2420_v59 = vor.u32 %v2890_v49, %v2417_v51  ;;  %v2886_v60 = vld [vmem:[%s3415_s6 + $0x2ec] sm:$0xf0]  ;;  %v2818_v61 = vld [vmem:[%s3415_s6 + $0xd4] sm:$0xf]  ;;  %v2128_v1 = vor.u32 %v2822_v57, %v2127_v56  ;;  %v2265_v43 = vld [vmem:[%s3415_s6 + $0x1f8] sm:$0xf0] }
  0x67   : > { %v2129_v62 = vld [vmem:[%s3415_s6 + $0xf0] sm:$0xf0]  ;;  %v2095_v4 = vld [vmem:[%s3415_s6 + $0x90] sm:$0xf]  ;;  %v2521_v47 = vld [vmem:[%s3415_s6 + $0x3f8] sm:$0xf0]  ;;  %v2264_v49 = vor.u32 %v2855_v38, %v2263_v37 }
  0x68   : > { %1129 = vmatpush.bf16.msrb.mxu1 %v2312_v58  ;;  %1155 = vmatpush.bf16.msrb.mxu3 %v2316_v63  ;;  %v2383_v58 = vld [vmem:[%s3415_s6 + $0x2d0] sm:$0xf]  ;;  %v2882_v63 = vld [vmem:[%s3415_s6 + $0x2d4] sm:$0xf]  ;;  %v2132_v3 = vor.u32 %v2818_v61, %v2129_v62  ;;  %v2487_v56 = vld [vmem:[%s3415_s6 + $0x398] sm:$0xf]  ;;  %v2524_v57 = vor.u32 %v2915_v46, %v2521_v47 }
  0x69   : > { %v2385_v0 = vld [vmem:[%s3415_s6 + $0x2f0] sm:$0xf0]  ;;  %v2384_v2 = vor.u32 %v2886_v60, %v2383_v58  ;;  %v2814_v5 = vld [vmem:[%s3415_s6 + $0xac] sm:$0xf0]  ;;  %v2911_v58 = vld [vmem:[%s3415_s6 + $0x3b4] sm:$0xf0] }
  0x6a   : > { %1117 = vmatpush.bf16.msrb.mxu0 %v2024_v6  ;;  %1143 = vmatpush.bf16.msrb.mxu2 %v2028_v11  ;;  %v2351_v6 = vld [vmem:[%s3415_s6 + $0x290] sm:$0xf]  ;;  %v2388_v7 = vor.u32 %v2882_v63, %v2385_v0  ;;  %v2810_v9 = vld [vmem:[%s3415_s6 + $0x94] sm:$0xf]  ;;  %v2096_v13 = vor.u32 %v2814_v5, %v2095_v4  ;;  %v2233_v60 = vld [vmem:[%s3415_s6 + $0x1b8] sm:$0xf0]  ;;  %v2488_v0 = vor.u32 %v2911_v58, %v2487_v56 }
  0x6b   : > { %v2878_v8 = vld [vmem:[%s3415_s6 + $0x2ac] sm:$0xf0]  ;;  %v2874_v11 = vld [vmem:[%s3415_s6 + $0x294] sm:$0xf]  ;;  %v2907_v61 = vld [vmem:[%s3415_s6 + $0x39c] sm:$0xf] }
  0x6c   : > { %1130 = vmatpush.bf16.msrb.mxu1 %v2280_v10  ;;  %1156 = vmatpush.bf16.msrb.mxu3 %v2284_v14  ;;  %v2097_v10 = vld [vmem:[%s3415_s6 + $0xb0] sm:$0xf0]  ;;  %v2352_v14 = vor.u32 %v2878_v8, %v2351_v6  ;;  %v2319_v18 = vld [vmem:[%s3415_s6 + $0x250] sm:$0xf]  ;;  %v2489_v62 = vld [vmem:[%s3415_s6 + $0x3b8] sm:$0xf0] }
  0x6d   : > { %1144 = vmatmul.bf16.vlgmr.msrb.gmra.mxu2 %v3496_v50  ;;  %1118 = vmatmul.bf16.vlgmr.msrb.gmra.mxu0 %v3496_v50  ;;  %v2353_v12 = vld [vmem:[%s3415_s6 + $0x2b0] sm:$0xf0]  ;;  %v2870_v20 = vld [vmem:[%s3415_s6 + $0x26c] sm:$0xf0]  ;;  %v2455_v4 = vld [vmem:[%s3415_s6 + $0x358] sm:$0xf]  ;;  %v2492_v5 = vor.u32 %v2907_v61, %v2489_v62 }
  0x6e   : > { %1162 = vmatpush.bf16.msra.mxu0 %v2256_v15  ;;  %1188 = vmatpush.bf16.msra.mxu2 %v2260_v17  ;;  %v2100_v15 = vor.u32 %v2810_v9, %v2097_v10  ;;  %v2806_v17 = vld [vmem:[%s3415_s6 + $0x6c] sm:$0xf0]  ;;  %v2356_v19 = vor.u32 %v2874_v11, %v2353_v12  ;;  %v2065_v22 = vld [vmem:[%s3415_s6 + $0x70] sm:$0xf0]  ;;  %v2903_v6 = vld [vmem:[%s3415_s6 + $0x374] sm:$0xf0] }
  0x6f   : > { %1157 = vmatmul.bf16.vlgmr.msrb.gmra.mxu3 %v3501_v54  ;;  %1131 = vmatmul.bf16.vlgmr.msrb.gmra.mxu1 %v3501_v54  ;;  %v2866_v23 = vld [vmem:[%s3415_s6 + $0x254] sm:$0xf]  ;;  %v2031_v26 = vld [vmem:[%s3415_s6 + $0x10] sm:$0xf]  ;;  %v2201_v8 = vld [vmem:[%s3415_s6 + $0x178] sm:$0xf0]  ;;  %v2456_v12 = vor.u32 %v2903_v6, %v2455_v4 }
  0x70   : > { %1175 = vmatpush.bf16.msra.mxu1 %v2512_v16  ;;  %1201 = vmatpush.bf16.msra.mxu3 %v2516_v21  ;;  %v2063_v16 = vld [vmem:[%s3415_s6 + $0x50] sm:$0xf]  ;;  %v2802_v21 = vld [vmem:[%s3415_s6 + $0x54] sm:$0xf]  ;;  %v2899_v9 = vld [vmem:[%s3415_s6 + $0x35c] sm:$0xf] }
  0x71   : > { %v2321_v24 = vld [vmem:[%s3415_s6 + $0x270] sm:$0xf0]  ;;  %v2064_v25 = vor.u32 %v2806_v17, %v2063_v16  ;;  %v2287_v30 = vld [vmem:[%s3415_s6 + $0x210] sm:$0xf]  ;;  %v2457_v10 = vld [vmem:[%s3415_s6 + $0x378] sm:$0xf0] }
  0x72   : > { %1163 = vmatpush.bf16.msra.mxu0 %v2224_v27  ;;  %1189 = vmatpush.bf16.msra.mxu2 %v2228_v29  ;;  %v2798_v27 = vld [vmem:[%s3415_s6 + $0x2c] sm:$0xf0]  ;;  %v2068_v29 = vor.u32 %v2802_v21, %v2065_v22  ;;  %v2794_v32 = vld [vmem:[%s3415_s6 + $0x14] sm:$0xf]  ;;  %v2423_v16 = vld [vmem:[%s3415_s6 + $0x318] sm:$0xf]  ;;  %v2460_v17 = vor.u32 %v2899_v9, %v2457_v10 }
  0x73   : > { %v2862_v31 = vld [vmem:[%s3415_s6 + $0x22c] sm:$0xf0]  ;;  %v2033_v34 = vld [vmem:[%s3415_s6 + $0x30] sm:$0xf0]  ;;  %v2891_v21 = vld [vmem:[%s3415_s6 + $0x31c] sm:$0xf] }
  0x74   : > { %1176 = vmatpush.bf16.msra.mxu1 %v2480_v28  ;;  %1202 = vmatpush.bf16.msra.mxu3 %v2484_v33  ;;  %v2320_v28 = vor.u32 %v2870_v20, %v2319_v18  ;;  %v2324_v33 = vor.u32 %v2866_v23, %v2321_v24  ;;  %v2858_v35 = vld [vmem:[%s3415_s6 + $0x214] sm:$0xf]  ;;  %v2288_v44 = vor.u32 %v2862_v31, %v2287_v30  ;;  %v2895_v18 = vld [vmem:[%s3415_s6 + $0x334] sm:$0xf0]  ;;  %v2169_v20 = vld [vmem:[%s3415_s6 + $0x138] sm:$0xf0] }
  0x75   : > { %v2289_v36 = vld [vmem:[%s3415_s6 + $0x230] sm:$0xf0]  ;;  %v2425_v22 = vld [vmem:[%s3415_s6 + $0x338] sm:$0xf0]  ;;  %v2424_v24 = vor.u32 %v2895_v18, %v2423_v16  ;;  %v2887_v30 = vld [vmem:[%s3415_s6 + $0x2f4] sm:$0xf0] }
  0x76   : > { %1164 = vmatpush.bf16.msra.mxu0 %v2192_v39  ;;  %1190 = vmatpush.bf16.msra.mxu2 %v2196_v41  ;;  %v2519_v39 = vld [vmem:[%s3415_s6 + $0x3d8] sm:$0xf]  ;;  %v2292_v48 = vor.u32 %v2858_v35, %v2289_v36  ;;  %v2819_v31 = vld [vmem:[%s3415_s6 + $0xdc] sm:$0xf]  ;;  %v2933_v16 = vld [vmem:[%s3698_s19 + $0x64] sm:$0xf0] }
  0x77   : > { %v2919_v41 = vld [vmem:[%s3415_s6 + $0x3f4] sm:$0xf0]  ;;  %v2361_v46 = vld [vmem:[%s3415_s6 + $0x2b8] sm:$0xf0] }
  0x78   : > { %1177 = vmatpush.bf16.msra.mxu1 %v2448_v40  ;;  %1203 = vmatpush.bf16.msra.mxu3 %v2452_v45  ;;  %v2032_v40 = vor.u32 %v2798_v27, %v2031_v26  ;;  %v2036_v45 = vor.u32 %v2794_v32, %v2033_v34  ;;  %v2520_v51 = vor.u32 %v2919_v41, %v2519_v39  ;;  %v2135_v26 = vld [vmem:[%s3415_s6 + $0xd8] sm:$0xf]  ;;  %v2137_v32 = vld [vmem:[%s3415_s6 + $0xf8] sm:$0xf0] }
  0x79   : > { %v2823_v27 = vld [vmem:[%s3415_s6 + $0xf4] sm:$0xf0]  ;;  %v2393_v34 = vld [vmem:[%s3415_s6 + $0x2f8] sm:$0xf0]  ;;  %v2140_v37 = vor.u32 %v2819_v31, %v2137_v32  ;;  %v2635_v31 = vld [vmem:[%s3698_s19 + $0xd0] sm:$0xf] }
  0x7a   : > { %1165 = vmatpush.bf16.msra.mxu0 %v2160_v52  ;;  %1191 = vmatpush.bf16.msra.mxu2 %v2164_v55  ;;  %v2268_v52 = vor.u32 %v2851_v42, %v2265_v43  ;;  %v2847_v55 = vld [vmem:[%s3415_s6 + $0x1b4] sm:$0xf0]  ;;  %v2136_v35 = vor.u32 %v2823_v27, %v2135_v26  ;;  %v2811_v43 = vld [vmem:[%s3415_s6 + $0x9c] sm:$0xf] }
  0x7b   : > { %v2103_v38 = vld [vmem:[%s3415_s6 + $0x98] sm:$0xf]  ;;  %v2073_v58 = vld [vmem:[%s3415_s6 + $0x78] sm:$0xf0] }
  0x7c   : > { %1178 = vmatpush.bf16.msra.mxu1 %v2416_v53  ;;  %1204 = vmatpush.bf16.msra.mxu3 %v2420_v59  ;;  %v2231_v53 = vld [vmem:[%s3415_s6 + $0x198] sm:$0xf]  ;;  %v2843_v59 = vld [vmem:[%s3415_s6 + $0x19c] sm:$0xf] }
  0x7d   : > { %v2232_v63 = vor.u32 %v2847_v55, %v2231_v53  ;;  %v2815_v39 = vld [vmem:[%s3415_s6 + $0xb4] sm:$0xf0]  ;;  %v2041_v6 = vld [vmem:[%s3415_s6 + $0x38] sm:$0xf0] }
  0x7e   : > { %1166 = vmatpush.bf16.msra.mxu0 %v2128_v1  ;;  %1192 = vmatpush.bf16.msra.mxu2 %v2132_v3  ;;  %v2236_v1 = vor.u32 %v2843_v59, %v2233_v60  ;;  %v2839_v3 = vld [vmem:[%s3415_s6 + $0x174] sm:$0xf0]  ;;  %v2104_v47 = vor.u32 %v2815_v39, %v2103_v38  ;;  %v2867_v59 = vld [vmem:[%s3415_s6 + $0x25c] sm:$0xf] }
  0x7f   : > { %v2879_v42 = vld [vmem:[%s3415_s6 + $0x2b4] sm:$0xf0]  ;;  %v2329_v60 = vld [vmem:[%s3415_s6 + $0x278] sm:$0xf0] }
  0x80   : > { %1179 = vmatpush.bf16.msra.mxu1 %v2384_v2  ;;  %1205 = vmatpush.bf16.msra.mxu3 %v2388_v7  ;;  %v2199_v2 = vld [vmem:[%s3415_s6 + $0x158] sm:$0xf]  ;;  %v2835_v7 = vld [vmem:[%s3415_s6 + $0x15c] sm:$0xf] }
  0x81   : > { %v2200_v11 = vor.u32 %v2839_v3, %v2199_v2  ;;  %v2327_v53 = vld [vmem:[%s3415_s6 + $0x258] sm:$0xf]  ;;  %v2332_v3 = vor.u32 %v2867_v59, %v2329_v60  ;;  %v2611_v59 = vld [vmem:[%s3698_s19 + $0xa0] sm:$0xf] }
  0x82   : > { %1167 = vmatpush.bf16.msra.mxu0 %v2096_v13  ;;  %1193 = vmatpush.bf16.msra.mxu2 %v2100_v15  ;;  %v2204_v13 = vor.u32 %v2835_v7, %v2201_v8  ;;  %v2831_v15 = vld [vmem:[%s3415_s6 + $0x134] sm:$0xf0]  ;;  %v2859_v7 = vld [vmem:[%s3415_s6 + $0x21c] sm:$0xf] }
  0x83   : > { %v2871_v56 = vld [vmem:[%s3415_s6 + $0x274] sm:$0xf0]  ;;  %v2297_v8 = vld [vmem:[%s3415_s6 + $0x238] sm:$0xf0] }
  0x84   : > { %1180 = vmatpush.bf16.msra.mxu1 %v2352_v14  ;;  %1206 = vmatpush.bf16.msra.mxu3 %v2356_v19  ;;  %v2167_v14 = vld [vmem:[%s3415_s6 + $0x118] sm:$0xf]  ;;  %v2827_v19 = vld [vmem:[%s3415_s6 + $0x11c] sm:$0xf]  ;;  %v2328_v62 = vor.u32 %v2871_v56, %v2327_v53 }
  0x85   : > { %v2168_v23 = vor.u32 %v2831_v15, %v2167_v14  ;;  %v2295_v2 = vld [vmem:[%s3415_s6 + $0x218] sm:$0xf] }
  0x86   : > { %1168 = vmatpush.bf16.msra.mxu0 %v2064_v25  ;;  %1194 = vmatpush.bf16.msra.mxu2 %v2068_v29  ;;  %v2172_v25 = vor.u32 %v2827_v19, %v2169_v20  ;;  %v2428_v29 = vor.u32 %v2891_v21, %v2425_v22  ;;  %v2863_v4 = vld [vmem:[%s3415_s6 + $0x234] sm:$0xf0]  ;;  %v2571_v20 = vld [vmem:[%s3698_s19 + $0x50] sm:$0xf] }
  0x87   : > { %v2296_v10 = vor.u32 %v2863_v4, %v2295_v2  ;;  %v2935_v14 = vld [vmem:[%s3698_s19 + $0x74] sm:$0xf0]  ;;  %v2715_v2 = vld [vmem:[%s3698_s19 + $0x170] sm:$0xf] }
  0x88   : > { %1181 = vmatpush.bf16.msra.mxu1 %v2320_v28  ;;  %1207 = vmatpush.bf16.msra.mxu3 %v2324_v33  ;;  %v2391_v28 = vld [vmem:[%s3415_s6 + $0x2d8] sm:$0xf]  ;;  %v2883_v33 = vld [vmem:[%s3415_s6 + $0x2dc] sm:$0xf] }
  0x89   : > { %v2392_v36 = vor.u32 %v2887_v30, %v2391_v28  ;;  %v2396_v41 = vor.u32 %v2883_v33, %v2393_v34  ;;  %v2951_v18 = vld [vmem:[%s3698_s19 + $0xf4] sm:$0xf0]  ;;  %v2563_v28 = vld [vmem:[%s3698_s19 + $0x40] sm:$0xf] }
  0x8a   : > { %1169 = vmatpush.bf16.msra.mxu0 %v2032_v40  ;;  %1195 = vmatpush.bf16.msra.mxu2 %v2036_v45  ;;  %v2359_v40 = vld [vmem:[%s3415_s6 + $0x298] sm:$0xf]  ;;  %v2875_v45 = vld [vmem:[%s3415_s6 + $0x29c] sm:$0xf] }
  0x8b   : > { %v2364_v55 = vor.u32 %v2875_v45, %v2361_v46  ;;  %v2931_v21 = vld [vmem:[%s3698_s19 + $0x54] sm:$0xf0]  ;;  %v2547_v45 = vld [vmem:[%s3698_s19 + $0x20] sm:$0xf]  ;;  %v2925_v46 = vld [vmem:[%s3698_s19 + $0x24] sm:$0xf0] }
  0x8c   : > { %1182 = vmatpush.bf16.msra.mxu1 %v2288_v44  ;;  %1208 = vmatpush.bf16.msra.mxu3 %v2292_v48  ;;  %v2105_v44 = vld [vmem:[%s3415_s6 + $0xb8] sm:$0xf0]  ;;  %v2360_v48 = vor.u32 %v2879_v42, %v2359_v40  ;;  %v2572_v22 = vor.u32 %v2931_v21, %v2571_v20  ;;  %v2947_v32 = vld [vmem:[%s3698_s19 + $0xd4] sm:$0xf0]  ;;  %v2627_v40 = vld [vmem:[%s3698_s19 + $0xc0] sm:$0xf] }
  0x8d   : > { %1170 = vmatmul.bf16.vlgmr.msra.gmra.mxu0 %v3496_v50  ;;  %1196 = vmatmul.bf16.vlgmr.msra.gmra.mxu2 %v3496_v50  ;;  %v2636_v33 = vor.u32 %v2947_v32, %v2635_v31  ;;  %v2923_v56 = vld [vmem:[%s3698_s19 + $0x14] sm:$0xf0]  ;;  %v2779_v21 = vld [vmem:[%s3698_s19 + $0x1f0] sm:$0xf]  ;;  %v2573_v31 = vld [vmem:[%s3698_s19 + $0x58] sm:$0xf0] }
  0x8e   : > { %1214 = vmatpush.bf16.msrb.mxu0 %v2264_v49  ;;  %1240 = vmatpush.bf16.msrb.mxu2 %v2268_v52  ;;  %v2108_v49 = vor.u32 %v2811_v43, %v2105_v44  ;;  %v2807_v52 = vld [vmem:[%s3415_s6 + $0x74] sm:$0xf0] }
  0x8f   : > { %1183 = vmatmul.bf16.vlgmr.msra.gmra.mxu1 %v3501_v54  ;;  %1209 = vmatmul.bf16.vlgmr.msra.gmra.mxu3 %v3501_v54 }
  0x90   : > { %1227 = vmatpush.bf16.msrb.mxu1 %v2520_v51  ;;  %1253 = vmatpush.bf16.msrb.mxu3 %v2524_v57  ;;  %v2071_v51 = vld [vmem:[%s3415_s6 + $0x58] sm:$0xf]  ;;  %v2803_v57 = vld [vmem:[%s3415_s6 + $0x5c] sm:$0xf] }
  0x91   : > { %v2072_v61 = vor.u32 %v2807_v52, %v2071_v51  ;;  %v2943_v51 = vld [vmem:[%s3698_s19 + $0xb4] sm:$0xf0] }
  0x92   : > { %1215 = vmatpush.bf16.msrb.mxu0 %v2232_v63  ;;  %1241 = vmatpush.bf16.msrb.mxu2 %v2236_v1  ;;  %v2076_v63 = vor.u32 %v2803_v57, %v2073_v58  ;;  %v2799_v1 = vld [vmem:[%s3415_s6 + $0x34] sm:$0xf0] }
  0x94   : > { %1228 = vmatpush.bf16.msrb.mxu1 %v2488_v0  ;;  %1254 = vmatpush.bf16.msrb.mxu3 %v2492_v5  ;;  %v2039_v0 = vld [vmem:[%s3415_s6 + $0x18] sm:$0xf]  ;;  %v2795_v5 = vld [vmem:[%s3415_s6 + $0x1c] sm:$0xf] }
  0x95   : > { %v2040_v9 = vor.u32 %v2799_v1, %v2039_v0  ;;  %v2921_v0 = vld [vmem:[%s3698_s19 + $0x4] sm:$0xf0] }
  0x96   : > { %1216 = vmatpush.bf16.msrb.mxu0 %v2200_v11  ;;  %1242 = vmatpush.bf16.msrb.mxu2 %v2204_v13  ;;  %v2044_v11 = vor.u32 %v2795_v5, %v2041_v6  ;;  %v2587_v13 = vld [vmem:[%s3698_s19 + $0x70] sm:$0xf]  ;;  %v2934_v5 = vld [vmem:[%s3698_s19 + $0x74] sm:$0xf]  ;;  %v2589_v6 = vld [vmem:[%s3698_s19 + $0x78] sm:$0xf0] }
  0x97   : > { %v2588_v15 = vor.u32 %v2935_v14, %v2587_v13  ;;  %v2707_v13 = vld [vmem:[%s3698_s19 + $0x160] sm:$0xf]  ;;  %v2965_v14 = vld [vmem:[%s3698_s19 + $0x164] sm:$0xf0] }
  0x98   : > { %1229 = vmatpush.bf16.msrb.mxu1 %v2456_v12  ;;  %1255 = vmatpush.bf16.msrb.mxu3 %v2460_v17  ;;  %v2300_v12 = vor.u32 %v2859_v7, %v2297_v8  ;;  %v2651_v17 = vld [vmem:[%s3698_s19 + $0xf0] sm:$0xf] }
  0x99   : > { %v2652_v19 = vor.u32 %v2951_v18, %v2651_v17  ;;  %v2603_v7 = vld [vmem:[%s3698_s19 + $0x90] sm:$0xf]  ;;  %v2595_v18 = vld [vmem:[%s3698_s19 + $0x80] sm:$0xf] }
  0x9a   : > { %1217 = vmatpush.bf16.msrb.mxu0 %v2168_v23  ;;  %1243 = vmatpush.bf16.msrb.mxu2 %v2172_v25  ;;  %v2643_v23 = vld [vmem:[%s3698_s19 + $0xe0] sm:$0xf] }
  0x9c   : > { %1230 = vmatpush.bf16.msrb.mxu1 %v2424_v24  ;;  %1256 = vmatpush.bf16.msrb.mxu3 %v2428_v29  ;;  %v2949_v24 = vld [vmem:[%s3698_s19 + $0xe4] sm:$0xf0] }
  0x9d   : > { %v2644_v26 = vor.u32 %v2949_v24, %v2643_v23  ;;  %v2929_v29 = vld [vmem:[%s3698_s19 + $0x44] sm:$0xf0]  ;;  %v2950_v23 = vld [vmem:[%s3698_s19 + $0xf4] sm:$0xf] }
  0x9e   : > { %1218 = vmatpush.bf16.msrb.mxu0 %v2136_v35  ;;  %1244 = vmatpush.bf16.msrb.mxu2 %v2140_v37  ;;  %v2564_v30 = vor.u32 %v2929_v29, %v2563_v28  ;;  %v2555_v35 = vld [vmem:[%s3698_s19 + $0x30] sm:$0xf] }
  0xa0   : > { %1231 = vmatpush.bf16.msrb.mxu1 %v2392_v36  ;;  %1257 = vmatpush.bf16.msrb.mxu3 %v2396_v41  ;;  %v2927_v36 = vld [vmem:[%s3698_s19 + $0x34] sm:$0xf0]  ;;  %v2945_v41 = vld [vmem:[%s3698_s19 + $0xc4] sm:$0xf0] }
  0xa1   : > { %v2556_v38 = vor.u32 %v2927_v36, %v2555_v35  ;;  %v2628_v43 = vor.u32 %v2945_v41, %v2627_v40  ;;  %v2948_v36 = vld [vmem:[%s3698_s19 + $0xe4] sm:$0xf] }
  0xa2   : > { %1219 = vmatpush.bf16.msrb.mxu0 %v2104_v47  ;;  %1245 = vmatpush.bf16.msrb.mxu2 %v2108_v49  ;;  %v2548_v47 = vor.u32 %v2925_v46, %v2547_v45  ;;  %v2619_v49 = vld [vmem:[%s3698_s19 + $0xb0] sm:$0xf] }
  0xa3   : > { %v2620_v52 = vor.u32 %v2943_v51, %v2619_v49  ;;  %v2763_v49 = vld [vmem:[%s3698_s19 + $0x1d0] sm:$0xf]  ;;  %v2979_v51 = vld [vmem:[%s3698_s19 + $0x1d4] sm:$0xf0] }
  0xa4   : > { %1232 = vmatpush.bf16.msrb.mxu1 %v2360_v48  ;;  %1258 = vmatpush.bf16.msrb.mxu3 %v2364_v55  ;;  %v2539_v55 = vld [vmem:[%s3698_s19 + $0x10] sm:$0xf] }
  0xa5   : > { %v2540_v58 = vor.u32 %v2923_v56, %v2539_v55  ;;  %v2764_v55 = vor.u32 %v2979_v51, %v2763_v49  ;;  %v2637_v56 = vld [vmem:[%s3698_s19 + $0xd8] sm:$0xf0] }
  0xa6   : > { %1220 = vmatpush.bf16.msrb.mxu0 %v2072_v61  ;;  %1246 = vmatpush.bf16.msrb.mxu2 %v2076_v63  ;;  %v2941_v61 = vld [vmem:[%s3698_s19 + $0xa4] sm:$0xf0]  ;;  %v2531_v63 = vld [vmem:[%s3698_s19] sm:$0xf] }
  0xa7   : > { %v2532_v1 = vor.u32 %v2921_v0, %v2531_v63  ;;  %v2926_v63 = vld [vmem:[%s3698_s19 + $0x34] sm:$0xf]  ;;  %v2557_v0 = vld [vmem:[%s3698_s19 + $0x38] sm:$0xf0] }
  0xa8   : > { %1233 = vmatpush.bf16.msrb.mxu1 %v2328_v62  ;;  %1259 = vmatpush.bf16.msrb.mxu3 %v2332_v3  ;;  %v2612_v62 = vor.u32 %v2941_v61, %v2611_v59  ;;  %v2967_v3 = vld [vmem:[%s3698_s19 + $0x174] sm:$0xf0] }
  0xa9   : > { %v2716_v4 = vor.u32 %v2967_v3, %v2715_v2  ;;  %v2959_v59 = vld [vmem:[%s3698_s19 + $0x134] sm:$0xf0]  ;;  %v2560_v3 = vor.u32 %v2926_v63, %v2557_v0  ;;  %v2938_v63 = vld [vmem:[%s3698_s19 + $0x94] sm:$0xf]  ;;  %v2605_v0 = vld [vmem:[%s3698_s19 + $0x98] sm:$0xf0] }
  0xaa   : > { %1221 = vmatpush.bf16.msrb.mxu0 %v2040_v9  ;;  %1247 = vmatpush.bf16.msrb.mxu2 %v2044_v11  ;;  %v2939_v9 = vld [vmem:[%s3698_s19 + $0x94] sm:$0xf0]  ;;  %v2592_v11 = vor.u32 %v2934_v5, %v2589_v6  ;;  %v2977_v5 = vld [vmem:[%s3698_s19 + $0x1c4] sm:$0xf0]  ;;  %v2944_v6 = vld [vmem:[%s3698_s19 + $0xc4] sm:$0xf] }
  0xac   : > { %1234 = vmatpush.bf16.msrb.mxu1 %v2296_v10  ;;  %1260 = vmatpush.bf16.msrb.mxu3 %v2300_v12  ;;  %v2604_v12 = vor.u32 %v2939_v9, %v2603_v7  ;;  %v2629_v9 = vld [vmem:[%s3698_s19 + $0xc8] sm:$0xf0] }
  0xad   : > { %1222 = vmatmul.bf16.vlgmr.msrb.gmra.mxu0 %v3496_v50  ;;  %1248 = vmatmul.bf16.vlgmr.msrb.gmra.mxu2 %v3496_v50  ;;  %v2579_v50 = vld [vmem:[%s3698_s19 + $0x60] sm:$0xf] }
  0xae   : > { %1738 = vmatpush.bf16.msra.mxu0 %v2588_v15  ;;  %1764 = vmatpush.bf16.msra.mxu2 %v2716_v4  ;;  %v2708_v15 = vor.u32 %v2965_v14, %v2707_v13  ;;  %v2755_v4 = vld [vmem:[%s3698_s19 + $0x1c0] sm:$0xf]  ;;  %v2957_v13 = vld [vmem:[%s3698_s19 + $0x124] sm:$0xf0]  ;;  %v2924_v14 = vld [vmem:[%s3698_s19 + $0x24] sm:$0xf] }
  0xaf   : > { %1235 = vmatmul.bf16.vlgmr.msrb.gmra.mxu1 %v3501_v54  ;;  %1261 = vmatmul.bf16.vlgmr.msrb.gmra.mxu3 %v3501_v54  ;;  %v2580_v54 = vor.u32 %v2933_v16, %v2579_v50  ;;  %v2932_v50 = vld [vmem:[%s3698_s19 + $0x64] sm:$0xf]  ;;  %v2581_v16 = vld [vmem:[%s3698_s19 + $0x68] sm:$0xf0] }
  0xb0   : > { %1751 = vmatpush.bf16.msra.mxu1 %v2652_v19  ;;  %v2584_v17 = vor.u32 %v2932_v50, %v2581_v16  ;;  %v2937_v19 = vld [vmem:[%s3698_s19 + $0x84] sm:$0xf0] }
  0xb1   : > { %v2596_v20 = vor.u32 %v2937_v19, %v2595_v18  ;;  %v2747_v19 = vld [vmem:[%s3698_s19 + $0x1b0] sm:$0xf] }
  0xb2   : > { %1739 = vmatpush.bf16.msra.mxu0 %v2580_v54  ;;  %1765 = vmatpush.bf16.msra.mxu2 %v2708_v15 }
  0xb4   : > { %1752 = vmatpush.bf16.msra.mxu1 %v2644_v26  ;;  %v2699_v26 = vld [vmem:[%s3698_s19 + $0x150] sm:$0xf] }
  0xb6   : > { %1740 = vmatpush.bf16.msra.mxu0 %v2572_v22  ;;  %v2983_v22 = vld [vmem:[%s3698_s19 + $0x1f4] sm:$0xf0] }
  0xb7   : > { %v2780_v24 = vor.u32 %v2983_v22, %v2779_v21  ;;  %v2942_v21 = vld [vmem:[%s3698_s19 + $0xb4] sm:$0xf] }
  0xb8   : > { %1753 = vmatpush.bf16.msra.mxu1 %v2636_v33  ;;  %v2771_v33 = vld [vmem:[%s3698_s19 + $0x1e0] sm:$0xf] }
  0xb9   : > { %1777 = vmatpush.bf16.msra.mxu3 %v2780_v24  ;;  %v2621_v24 = vld [vmem:[%s3698_s19 + $0xb8] sm:$0xf0] }
  0xba   : > { %1741 = vmatpush.bf16.msra.mxu0 %v2564_v30  ;;  %v2930_v30 = vld [vmem:[%s3698_s19 + $0x54] sm:$0xf] }
  0xbb   : > { %v2576_v32 = vor.u32 %v2930_v30, %v2573_v31 }
  0xbc   : > { %1754 = vmatpush.bf16.msra.mxu1 %v2628_v43  ;;  %v2961_v43 = vld [vmem:[%s3698_s19 + $0x144] sm:$0xf0] }
  0xbe   : > { %1742 = vmatpush.bf16.msra.mxu0 %v2556_v38 }
  0xc0   : > { %1755 = vmatpush.bf16.msra.mxu1 %v2620_v52  ;;  %v2946_v52 = vld [vmem:[%s3698_s19 + $0xd4] sm:$0xf] }
  0xc2   : > { %1743 = vmatpush.bf16.msra.mxu0 %v2548_v47  ;;  %v2565_v47 = vld [vmem:[%s3698_s19 + $0x48] sm:$0xf0] }
  0xc4   : > { %1756 = vmatpush.bf16.msra.mxu1 %v2612_v62 }
  0xc6   : > { %1744 = vmatpush.bf16.msra.mxu0 %v2540_v58  ;;  %v2683_v58 = vld [vmem:[%s3698_s19 + $0x130] sm:$0xf] }
  0xc7   : > { %v2684_v62 = vor.u32 %v2959_v59, %v2683_v58  ;;  %v2731_v58 = vld [vmem:[%s3698_s19 + $0x190] sm:$0xf]  ;;  %v2971_v59 = vld [vmem:[%s3698_s19 + $0x194] sm:$0xf0] }
  0xc8   : > { %1757 = vmatpush.bf16.msra.mxu1 %v2604_v12  ;;  %v2675_v12 = vld [vmem:[%s3698_s19 + $0x120] sm:$0xf] }
  0xc9   : > { %v2676_v16 = vor.u32 %v2957_v13, %v2675_v12  ;;  %v2969_v13 = vld [vmem:[%s3698_s19 + $0x184] sm:$0xf0] }
  0xca   : > { %v1067_v25 = vpop.f32.mrf.mxu0  ;;  %1745 = vmatpush.bf16.msra.mxu0 %v2532_v1 }
  0xcc   : > { %v1080_v27 = vpop.f32.mrf.mxu1  ;;  %1758 = vmatpush.bf16.msra.mxu1 %v2596_v20  ;;  %v2975_v20 = vld [vmem:[%s3698_s19 + $0x1b4] sm:$0xf0] }
  0xcd   : > { %v3716_v39 = vadd.f32 %v1080_v27, %v1067_v25  ;;  %v2653_v25 = vld [vmem:[%s3698_s19 + $0xf8] sm:$0xf0]  ;;  %v2963_v27 = vld [vmem:[%s3698_s19 + $0x154] sm:$0xf0] }
  0xce   : > { %1790 = vmatpush.bf16.msrb.mxu0 %v2592_v11  ;;  %v2656_v28 = vor.u32 %v2950_v23, %v2653_v25  ;;  %v2700_v29 = vor.u32 %v2963_v27, %v2699_v26  ;;  %v2632_v11 = vor.u32 %v2944_v6, %v2629_v9  ;;  %v2748_v23 = vor.u32 %v2975_v20, %v2747_v19  ;;  %v2667_v26 = vld [vmem:[%s3698_s19 + $0x110] sm:$0xf]  ;;  %v2955_v27 = vld [vmem:[%s3698_s19 + $0x114] sm:$0xf0]  ;;  %v2964_v9 = vld [vmem:[%s3698_s19 + $0x164] sm:$0xf] }
  0xcf   : > { %v2525_v48 = vmul.f32 -1.442695, %v3716_v39  ;;  %v2624_v25 = vor.u32 %v2942_v21, %v2621_v24  ;;  %v2781_v21 = vld [vmem:[%s3698_s19 + $0x1f8] sm:$0xf0]  ;;  %v2962_v24 = vld [vmem:[%s3698_s19 + $0x154] sm:$0xf] }
  0xd0   : > { %v1093_v34 = vpop.f32.mrf.mxu2  ;;  %1803 = vmatpush.bf16.msrb.mxu1 %v2656_v28  ;;  %1766 = vmatpush.bf16.msra.mxu2 %v2700_v29  ;;  %v2922_v28 = vld [vmem:[%s3698_s19 + $0x14] sm:$0xf] }
  0xd1   : > { %3067 = vpow2.f32 %v2525_v48 }
  0xd2   : > { %v1106_v37 = vpop.f32.mrf.mxu3  ;;  %v1069_v42 = vpop.f32.mrf.mxu0  ;;  %1791 = vmatpush.bf16.msrb.mxu0 %v2584_v17  ;;  %v2549_v17 = vld [vmem:[%s3698_s19 + $0x28] sm:$0xf0] }
  0xd3   : > { %v3728_v60 = vadd.f32 %v1106_v37, %v1093_v34  ;;  %v2981_v34 = vld [vmem:[%s3698_s19 + $0x1e4] sm:$0xf0]  ;;  %v2645_v37 = vld [vmem:[%s3698_s19 + $0xe8] sm:$0xf0]  ;;  %v2691_v42 = vld [vmem:[%s3698_s19 + $0x140] sm:$0xf]  ;;  %v2552_v18 = vor.u32 %v2924_v14, %v2549_v17 }
  0xd4   : > { %v1082_v44 = vpop.f32.mrf.mxu1  ;;  %v2772_v35 = vor.u32 %v2981_v34, %v2771_v33  ;;  %v2648_v41 = vor.u32 %v2948_v36, %v2645_v37  ;;  %v2692_v46 = vor.u32 %v2961_v43, %v2691_v42  ;;  %v2541_v33 = vld [vmem:[%s3698_s19 + $0x18] sm:$0xf0]  ;;  %v2739_v34 = vld [vmem:[%s3698_s19 + $0x1a0] sm:$0xf]  ;;  %v2973_v37 = vld [vmem:[%s3698_s19 + $0x1a4] sm:$0xf0] }
  0xd5   : > { %v2526_v8 = vmul.f32 -1.442695, %v3728_v60  ;;  %v2928_v44 = vld [vmem:[%s3698_s19 + $0x44] sm:$0xf]  ;;  %v2544_v36 = vor.u32 %v2922_v28, %v2541_v33  ;;  %v2659_v42 = vld [vmem:[%s3698_s19 + $0x100] sm:$0xf] }
  0xd6   : > { %1792 = vmatpush.bf16.msrb.mxu0 %v2576_v32  ;;  %1778 = vmatpush.bf16.msra.mxu3 %v2772_v35  ;;  %v2568_v48 = vor.u32 %v2928_v44, %v2565_v47  ;;  %v2668_v32 = vor.u32 %v2955_v27, %v2667_v26  ;;  %v2740_v44 = vor.u32 %v2973_v37, %v2739_v34  ;;  %v2920_v47 = vld [vmem:[%s3698_s19 + $0x4] sm:$0xf]  ;;  %v2982_v17 = vld [vmem:[%s3698_s19 + $0x1f4] sm:$0xf] }
  0xd7   : > { %v3068_v10 = vpop.eup %3067  ;;  %3069 = vpow2.f32 %v2526_v8  ;;  %1804 = vmatpush.bf16.msrb.mxu1 %v2648_v41  ;;  %1767 = vmatpush.bf16.msra.mxu2 %v2692_v46  ;;  %v2756_v8 = vor.u32 %v2977_v5, %v2755_v4  ;;  %v2953_v46 = vld [vmem:[%s3698_s19 + $0x104] sm:$0xf0]  ;;  %v2936_v14 = vld [vmem:[%s3698_s19 + $0x84] sm:$0xf] }
  0xd8   : > { %v1095_v53 = vpop.f32.mrf.mxu2  ;;  %v3744_v54 = vadd.f32 1.0, %v3068_v10  ;;  %v2660_v51 = vor.u32 %v2953_v46, %v2659_v42  ;;  %v2960_v37 = vld [vmem:[%s3698_s19 + $0x144] sm:$0xf]  ;;  %v2978_v46 = vld [vmem:[%s3698_s19 + $0x1d4] sm:$0xf] }
  0xda   : > { %v1108_v57 = vpop.f32.mrf.mxu3  ;;  %3071 = vrcp.f32 %v3744_v54  ;;  %1793 = vmatpush.bf16.msrb.mxu0 %v2568_v48  ;;  %1779 = vmatpush.bf16.msra.mxu3 %v2764_v55  ;;  %v2533_v48 = vld [vmem:[%s3698_s19 + $0x8] sm:$0xf0]  ;;  %v2966_v55 = vld [vmem:[%s3698_s19 + $0x174] sm:$0xf]  ;;  %vm1287_vm0 = vweird.f32 %v3744_v54 }
  0xdb   : > { %v2640_v57 = vor.u32 %v2946_v52, %v2637_v56  ;;  %1768 = vmatpush.bf16.msra.mxu2 %v2684_v62  ;;  %v2536_v52 = vor.u32 %v2920_v47, %v2533_v48  ;;  %v2717_v56 = vld [vmem:[%s3698_s19 + $0x178] sm:$0xf0]  ;;  %v2732_v62 = vor.u32 %v2971_v59, %v2731_v58  ;;  %v2976_v59 = vld [vmem:[%s3698_s19 + $0x1c4] sm:$0xf] }
  0xdd   : > { %v3070_v38 = vpop.eup %3069  ;;  %1805 = vmatpush.bf16.msrb.mxu1 %v2640_v57  ;;  %v2720_v57 = vor.u32 %v2966_v55, %v2717_v56  ;;  %v2685_v55 = vld [vmem:[%s3698_s19 + $0x138] sm:$0xf0] }
  0xde   : > { %v3768_v53 = vadd.f32 1.0, %v3070_v38  ;;  %1794 = vmatpush.bf16.msrb.mxu0 %v2560_v3  ;;  %1780 = vmatpush.bf16.msra.mxu3 %v2756_v8  ;;  %v2940_v38 = vld [vmem:[%s3698_s19 + $0xa4] sm:$0xf]  ;;  %v1293_v3 = vand.u32 2147483648, %v3744_v54  ;;  %v2608_v8 = vor.u32 %v2938_v63, %v2605_v0 }
  0xdf   : > { %1769 = vmatpush.bf16.msra.mxu2 %v2676_v16  ;;  %v2597_v16 = vld [vmem:[%s3698_s19 + $0x88] sm:$0xf0] }
  0xe0   : > { %v3775_v1 = vpop.eup %3071  ;;  %3073 = vrcp.f32 %v3768_v53  ;;  %vm1302_vm4 = vweird.f32 %v3768_v53  ;;  %v1306_v26 = vand.u32 2147483647, %v3768_v53  ;;  %v1308_v28 = vand.u32 2147483648, %v3768_v53 }
  0xe1   : > { %v1283_v15 = vmul.f32 %v3775_v1, %v3744_v54  ;;  %1806 = vmatpush.bf16.msrb.mxu1 %v2632_v11  ;;  %vm1288_vm1 = vweird.f32 %v3775_v1  ;;  %v2723_v11 = vld [vmem:[%s3698_s19 + $0x180] sm:$0xf] }
  0xe2   : > { %1795 = vmatpush.bf16.msrb.mxu0 %v2552_v18  ;;  %1781 = vmatpush.bf16.msra.mxu3 %v2748_v23  ;;  %vm3833_vm2 = vmor %vm1287_vm0, %vm1288_vm1  ;;  %v1294_v18 = vor.u32 1.1754944e-38, %v1293_v3  ;;  %v2784_v23 = vor.u32 %v2982_v17, %v2781_v21  ;;  %vm1307_vm7 = vcmp.eq.f32.partialorder %v1306_v26, 8.507059e+37  ;;  %v2956_v3 = vld [vmem:[%s3698_s19 + $0x124] sm:$0xf] }
  0xe3   : > { %v1284_v30 = vsub.f32 1.0, %v1283_v15  ;;  %1770 = vmatpush.bf16.msra.mxu2 %v2668_v32 }
  0xe5   : > { %1807 = vmatpush.bf16.msrb.mxu1 %v2624_v25  ;;  %v1285_v49 = vmul.f32 %v3775_v1, %v1284_v30  ;;  %v2701_v25 = vld [vmem:[%s3698_s19 + $0x158] sm:$0xf0]  ;;  %v2773_v30 = vld [vmem:[%s3698_s19 + $0x1e8] sm:$0xf0] }
  0xe6   : > { %v3798_v29 = vpop.eup %3073  ;;  %1796 = vmatpush.bf16.msrb.mxu0 %v2544_v36  ;;  %1782 = vmatpush.bf16.msra.mxu3 %v2740_v44  ;;  %v2704_v27 = vor.u32 %v2962_v24, %v2701_v25  ;;  %v1309_v44 = vor.u32 1.1754944e-38, %v1308_v28  ;;  %v2970_v24 = vld [vmem:[%s3698_s19 + $0x194] sm:$0xf]  ;;  %v2733_v25 = vld [vmem:[%s3698_s19 + $0x198] sm:$0xf0] }
  0xe7   : > { %v1298_v43 = vmul.f32 %v3798_v29, %v3768_v53  ;;  %1771 = vmatpush.bf16.msra.mxu2 %v2660_v51  ;;  %v1286_v6 = vadd.f32 %v3775_v1, %v1285_v49  ;;  %vm1303_vm5 = vweird.f32 %v3798_v29  ;;  %v2765_v53 = vld [vmem:[%s3698_s19 + $0x1d8] sm:$0xf0] }
  0xe8   : > { %vm3860_vm6 = vmor %vm1302_vm4, %vm1303_vm5  ;;  %v2768_v49 = vor.u32 %v2978_v46, %v2765_v53 }
  0xe9   : > { %v1299_v4 = vsub.f32 1.0, %v1298_v43 }
  0xea   : > { %v1119_v40 = vpop.f32.mrf.mxu0  ;;  %1797 = vmatpush.bf16.msrb.mxu0 %v2536_v52  ;;  %1783 = vmatpush.bf16.msra.mxu3 %v2732_v62  ;;  %v2958_v52 = vld [vmem:[%s3698_s19 + $0x134] sm:$0xf] }
  0xeb   : > { %1816 = vmatpush.bf16.msrb.mxu2 %v2720_v57  ;;  %v1300_v19 = vmul.f32 %v3798_v29, %v1299_v4  ;;  %v2688_v56 = vor.u32 %v2958_v52, %v2685_v55  ;;  %v2677_v4 = vld [vmem:[%s3698_s19 + $0x128] sm:$0xf0] }
  0xec   : > { %v1132_v45 = vpop.f32.mrf.mxu1 }
  0xed   : > { %v3781_v7 = vadd.f32 %v1132_v45, %v1119_v40  ;;  %v2613_v40 = vld [vmem:[%s3698_s19 + $0xa8] sm:$0xf0]  ;;  %v1301_v32 = vadd.f32 %v3798_v29, %v1300_v19 }
  0xee   : > { %v2616_v45 = vor.u32 %v2940_v38, %v2613_v40  ;;  %v2693_v38 = vld [vmem:[%s3698_s19 + $0x148] sm:$0xf0] }
  0xef   : > { %v2527_v22 = vmul.f32 -1.442695, %v3781_v7  ;;  %v2696_v42 = vor.u32 %v2960_v37, %v2693_v38  ;;  %v1305_v47 = vsel %vm3860_vm6, %v3798_v29, %v1301_v32  ;;  %v2741_v19 = vld [vmem:[%s3698_s19 + $0x1a8] sm:$0xf0] }
  0xf0   : > { %v1145_v61 = vpop.f32.mrf.mxu2  ;;  %1808 = vmatpush.bf16.msrb.mxu1 %v2616_v45  ;;  %v1310_v57 = vsel %vm1307_vm7, %v1309_v44, %v1305_v47 }
  0xf1   : > { %3075 = vpow2.f32 %v2527_v22  ;;  %v1290_v22 = vsel %vm3833_vm2, %v3775_v1, %v1286_v6  ;;  %v2980_v1 = vld [vmem:[%s3698_s19 + $0x1e4] sm:$0xf] }
  0xf2   : > { %v1158_v2 = vpop.f32.mrf.mxu3  ;;  %v1121_v10 = vpop.f32.mrf.mxu0  ;;  %v2776_v33 = vor.u32 %v2980_v1, %v2773_v30  ;;  %v2736_v30 = vor.u32 %v2970_v24, %v2733_v25 }
  0xf3   : > { %v3805_v41 = vadd.f32 %v1158_v2, %v1145_v61  ;;  %v1291_v2 = vand.u32 2147483647, %v3744_v54  ;;  %v2709_v10 = vld [vmem:[%s3698_s19 + $0x168] sm:$0xf0]  ;;  %v2600_v54 = vor.u32 %v2936_v14, %v2597_v16 }
  0xf4   : > { %v1134_v50 = vpop.f32.mrf.mxu1  ;;  %1809 = vmatpush.bf16.msrb.mxu1 %v2608_v8  ;;  %v2712_v15 = vor.u32 %v2964_v9, %v2709_v10  ;;  %v2680_v9 = vor.u32 %v2956_v3, %v2677_v4  ;;  %v2974_v10 = vld [vmem:[%s3698_s19 + $0x1b4] sm:$0xf] }
  0xf5   : > { %v2528_v61 = vmul.f32 -1.442695, %v3805_v41  ;;  %v2724_v50 = vor.u32 %v2969_v13, %v2723_v11  ;;  %vm1292_vm3 = vcmp.eq.f32.partialorder %v1291_v2, 8.507059e+37  ;;  %v2749_v11 = vld [vmem:[%s3698_s19 + $0x1b8] sm:$0xf0] }
  0xf6   : > { %1817 = vmatpush.bf16.msrb.mxu2 %v2712_v15  ;;  %v2752_v13 = vor.u32 %v2974_v10, %v2749_v11  ;;  %v2954_v15 = vld [vmem:[%s3698_s19 + $0x114] sm:$0xf] }
  0xf7   : > { %v3076_v5 = vpop.eup %3075  ;;  %3077 = vpow2.f32 %v2528_v61  ;;  %1784 = vmatpush.bf16.msra.mxu3 %v2724_v50  ;;  %v2757_v61 = vld [vmem:[%s3698_s19 + $0x1c8] sm:$0xf0]  ;;  %v2669_v50 = vld [vmem:[%s3698_s19 + $0x118] sm:$0xf0] }
  0xf8   : > { %v1147_v31 = vpop.f32.mrf.mxu2  ;;  %v3842_v20 = vadd.f32 1.0, %v3076_v5  ;;  %1810 = vmatpush.bf16.msrb.mxu1 %v2600_v54  ;;  %v2760_v62 = vor.u32 %v2976_v59, %v2757_v61  ;;  %v1343_v5 = vmul.f32 %v1310_v57, %v3728_v60  ;;  %v2672_v17 = vor.u32 %v2954_v15, %v2669_v50  ;;  %v2952_v54 = vld [vmem:[%s3698_s19 + $0x104] sm:$0xf] }
  0xf9   : > { %v1295_v31 = vsel %vm1292_vm3, %v1294_v18, %v1290_v22  ;;  %v2972_v18 = vld [vmem:[%s3698_s19 + $0x1a4] sm:$0xf]  ;;  %v2661_v22 = vld [vmem:[%s3698_s19 + $0x108] sm:$0xf0] }
  0xfa   : > { %v1160_v35 = vpop.f32.mrf.mxu3  ;;  %3079 = vrcp.f32 %v3842_v20  ;;  %1818 = vmatpush.bf16.msrb.mxu2 %v2704_v27  ;;  %v1342_v43 = vmul.f32 %v1295_v31, %v3716_v39  ;;  %v2744_v21 = vor.u32 %v2972_v18, %v2741_v19  ;;  %v2664_v28 = vor.u32 %v2952_v54, %v2661_v22 }
  0xfb   : > { %1829 = vmatpush.bf16.msrb.mxu3 %v2784_v23  ;;  %vm1317_vm8 = vweird.f32 %v3842_v20  ;;  %v1323_v31 = vand.u32 2147483648, %v3842_v20  ;;  %v2968_v35 = vld [vmem:[%s3698_s19 + $0x184] sm:$0xf] }
  0xfd   : > { %v3078_v34 = vpop.eup %3077  ;;  %v1324_v38 = vor.u32 1.1754944e-38, %v1323_v31 }
  0xfe   : > { %v3872_v48 = vadd.f32 1.0, %v3078_v34  ;;  %1819 = vmatpush.bf16.msrb.mxu2 %v2696_v42  ;;  %v1321_v34 = vand.u32 2147483647, %v3842_v20 }
  0xff   : > { %1830 = vmatpush.bf16.msrb.mxu3 %v2776_v33 }
 0x100   : > { %v3876_v39 = vpop.eup %3079  ;;  %3081 = vrcp.f32 %v3872_v48  ;;  %vm1322_vm11 = vcmp.eq.f32.partialorder %v1321_v34, 8.507059e+37  ;;  %vm1332_vm12 = vweird.f32 %v3872_v48 }
 0x101   : > { %v1313_v63 = vmul.f32 %v3876_v39, %v3842_v20  ;;  %vm1318_vm9 = vweird.f32 %v3876_v39  ;;  %v1336_v20 = vand.u32 2147483647, %v3872_v48 }
 0x102   : > { %1820 = vmatpush.bf16.msrb.mxu2 %v2688_v56  ;;  %vm1319_vm10 = vmor %vm1317_vm8, %vm1318_vm9 }
 0x103   : > { %1831 = vmatpush.bf16.msrb.mxu3 %v2768_v49  ;;  %v1314_v14 = vsub.f32 1.0, %v1313_v63  ;;  %vm1337_vm15 = vcmp.eq.f32.partialorder %v1336_v20, 8.507059e+37 }
 0x105   : > { %v1315_v1 = vmul.f32 %v3876_v39, %v1314_v14 }
 0x106   : > { %1821 = vmatpush.bf16.msrb.mxu2 %v2680_v9  ;;  %v3082_v16 = vpop.eup %3081 }
 0x107   : > { %1832 = vmatpush.bf16.msrb.mxu3 %v2760_v62  ;;  %v1328_v26 = vmul.f32 %v3082_v16, %v3872_v48  ;;  %v1316_v33 = vadd.f32 %v3876_v39, %v1315_v1  ;;  %vm1333_vm13 = vweird.f32 %v3082_v16 }
 0x108   : > { %vm1334_vm14 = vmor %vm1332_vm12, %vm1333_vm13 }
 0x109   : > { %v1329_v32 = vsub.f32 1.0, %v1328_v26  ;;  %v1320_v42 = vsel %vm1319_vm10, %v3876_v39, %v1316_v33 }
 0x10a   : > { %v1171_v36 = vpop.f32.mrf.mxu0  ;;  %1822 = vmatpush.bf16.msrb.mxu2 %v2672_v17  ;;  %v1325_v44 = vsel %vm1322_vm11, %v1324_v38, %v1320_v42 }
 0x10b   : > { %1833 = vmatpush.bf16.msrb.mxu3 %v2752_v13  ;;  %v1344_v47 = vmul.f32 %v1325_v44, %v3781_v7 }
 0x10c   : > { %v1184_v40 = vpop.f32.mrf.mxu1 }
 0x10d   : > { %v1185_v45 = vadd.f32 %v1184_v40, %v1171_v36  ;;  %v2725_v36 = vld [vmem:[%s3698_s19 + $0x188] sm:$0xf0]  ;;  %v1330_v40 = vmul.f32 %v3082_v16, %v1329_v32 }
 0x10e   : > { %1823 = vmatpush.bf16.msrb.mxu2 %v2664_v28  ;;  %v2728_v37 = vor.u32 %v2968_v35, %v2725_v36 }
 0x10f   : > { %v1346_v51 = vmul.f32 %v1342_v43, %v1185_v45  ;;  %1834 = vmatpush.bf16.msrb.mxu3 %v2744_v21  ;;  %v1338_v43 = vand.u32 2147483648, %v3872_v48  ;;  %v1331_v45 = vadd.f32 %v3082_v16, %v1330_v40 }
 0x110   : > { %v1197_v29 = vpop.f32.mrf.mxu2 }
 0x111   : > { %v1350_v58 = vpack.c.bf16 %v1346_v51, %v1346_v51  ;;  %v1339_v49 = vor.u32 1.1754944e-38, %v1338_v43  ;;  %v1335_v52 = vsel %vm1334_vm14, %v3082_v16, %v1331_v45 }
 0x112   : > { %v1210_v0 = vpop.f32.mrf.mxu3  ;;  %v1173_v2 = vpop.f32.mrf.mxu0 }
 0x113   : > { %1746 = vmatmul.bf16.vlgmr.msra.gmra.mxu0 %v1350_v58  ;;  %v1211_v6 = vadd.f32 %v1210_v0, %v1197_v29  ;;  %1835 = vmatpush.bf16.msrb.mxu3 %v2736_v30  ;;  %v1340_v39 = vsel %vm1337_vm15, %v1339_v49, %v1335_v52 }
 0x114   : > { %v1186_v8 = vpop.f32.mrf.mxu1  ;;  %v1345_v61 = vmul.f32 %v1340_v39, %v3805_v41 }
 0x115   : > { %v1347_v12 = vmul.f32 %v1343_v5, %v1211_v6 }
 0x117   : > { %v1351_v60 = vpack.c.bf16 %v1347_v12, %v1347_v12  ;;  %1836 = vmatpush.bf16.msrb.mxu3 %v2728_v37 }
 0x118   : > { %v1199_v23 = vpop.f32.mrf.mxu2 }
 0x119   : > { %1759 = vmatmul.bf16.vlgmr.msra.gmra.mxu1 %v1351_v60 }
 0x11a   : > { %v1212_v27 = vpop.f32.mrf.mxu3 }
 0x123   : > { %1798 = vmatmul.bf16.vlgmr.msrb.gmra.mxu0 %v1350_v58 }
 0x129   : > { %1811 = vmatmul.bf16.vlgmr.msrb.gmra.mxu1 %v1351_v60 }
 0x12a   : > { %v1223_v46 = vpop.f32.mrf.mxu0 }
 0x12c   : > { %v1236_v53 = vpop.f32.mrf.mxu1 }
 0x12d   : > { %v1237_v51 = vadd.f32 %v1236_v53, %v1223_v46 }
 0x12f   : > { %v1348_v55 = vmul.f32 %v1344_v47, %v1237_v51 }
 0x130   : > { %v1249_v57 = vpop.f32.mrf.mxu2 }
 0x131   : > { %v1352_v56 = vpack.c.bf16 %v1348_v55, %v1348_v55 }
 0x132   : > { %v1262_v58 = vpop.f32.mrf.mxu3  ;;  %v1225_v59 = vpop.f32.mrf.mxu0 }
 0x133   : > { %1772 = vmatmul.bf16.vlgmr.msra.gmra.mxu2 %v1352_v56  ;;  %v1263_v48 = vadd.f32 %v1262_v58, %v1249_v57 }
 0x134   : > { %v1238_v29 = vpop.f32.mrf.mxu1 }
 0x135   : > { %v1349_v62 = vmul.f32 %v1345_v61, %v1263_v48 }
 0x137   : > { %v1353_v63 = vpack.c.bf16 %v1349_v62, %v1349_v62 }
 0x138   : > { %v1251_v7 = vpop.f32.mrf.mxu2 }
 0x139   : > { %1785 = vmatmul.bf16.vlgmr.msra.gmra.mxu3 %v1353_v63 }
 0x13a   : > { %v1264_v0 = vpop.f32.mrf.mxu3 }
 0x143   : > { %1824 = vmatmul.bf16.vlgmr.msrb.gmra.mxu2 %v1352_v56 }
 0x149   : > { %1837 = vmatmul.bf16.vlgmr.msrb.gmra.mxu3 %v1353_v63 }
 0x190   : > { %v1747_v2 = vpop.f32.mrf.mxu0 }
 0x196   : > { %v1760_v3 = vpop.f32.mrf.mxu1 }
 0x197   : > { %v1761_v11 = vadd.f32 %v1760_v3, %v1747_v2 }
 0x198   : > { %v1749_v4 = vpop.f32.mrf.mxu0 }
 0x19e   : > { %v1762_v5 = vpop.f32.mrf.mxu1 }
 0x1a0   : > { %v1799_v6 = vpop.f32.mrf.mxu0 }
 0x1a6   : > { %v1812_v8 = vpop.f32.mrf.mxu1 }
 0x1a7   : > { %v1813_v60 = vadd.f32 %v1812_v8, %v1799_v6 }
 0x1a8   : > { %v1801_v9 = vpop.f32.mrf.mxu0 }
 0x1ae   : > { %v1814_v10 = vpop.f32.mrf.mxu1 }
 0x1b6   : > { %v1773_v41 = vpop.f32.mrf.mxu2 }
 0x1b7   : > { %v1774_v12 = vadd.f32 %v1773_v41, %v1761_v11 }
 0x1bc   : > { %v1786_v13 = vpop.f32.mrf.mxu3 }
 0x1bd   : > { %v1787_v14 = vadd.f32 %v1786_v13, %v1774_v12 }
 0x1be   : > { %v1775_v15 = vpop.f32.mrf.mxu2 }
 0x1bf   : > { %1846 = vst [vmem:[%s279_s22] sm:$0xff] %v1787_v14 }
 0x1c4   : > { %v1788_v50 = vpop.f32.mrf.mxu3 }
 0x1c6   : > { %v1825_v16 = vpop.f32.mrf.mxu2 }
 0x1c7   : > { %v1826_v17 = vadd.f32 %v1825_v16, %v1813_v60 }
 0x1cc   : > { %v1838_v18 = vpop.f32.mrf.mxu3 }
 0x1cd   : > { %v1839_v19 = vadd.f32 %v1838_v18, %v1826_v17 }
 0x1ce   : > { %v1827_v54 = vpop.f32.mrf.mxu2 }
 0x1cf   : > { %1847 = vst [vmem:[%s279_s22 + $0x8] sm:$0xff] %v1839_v19 }
 0x1d0   : > { %3200 = shalt.err (!%p3197_p13)
}
 0x1d1   : > { %2993 = dma.vmem_to_hbm [thread:$0]  (%p3376_p0), %s1875_s10, 256, %s1877_s11, %s1859_s21  }
 0x1d4   : > { %v1840_v21 = vpop.f32.mrf.mxu3 }
 0x1d5 PF: > { %s1888_s30 = sand.u32 1, %s3239_s12   ;;  %p3007_p4 = pnand %p2001_p3, %p3380_p2 }
 0x1d6   : > { %s1889_s19 = scalar_lea.sflag [#allocation4], %s1888_s30 }
 0x1d7   : > { %p3008_p5 = pneg %p3007_p4 }
 0x1d9   : > { %3234 = dma.done.wait (%p3008_p5), %s1889_s19, 256  }
 0x1da   : > { %3236 = vsyncadd (%p3008_p5), %s1889_s19, 4294967040  ;;  %s20_s17 = sadd.s32 1, %s3259_s17   ;;  %s3964_s12 = smov %s3243_s13 }
 0x1db   : > { %p17_p1 = scmp.ge.s32.totalorder %s20_s17, 4   ;;  %s3965_s13 = smov %s3247_s14 }
 0x1dc   : > { %s3966_s14 = smov %s3338_s25  ;;  %s3967_s15 = smov %s3255_s16 }
 0x1dd   : > { %s3968_s16 = smov %s3970_s18  ;;  %19 = sbr.rel (!%p17_p1) target bundleno = 7 (0x7), region = 102 }
 0x1e2   :  { %1895 = vsyncpa [#allocation3], 1 }
 0x1e3   :  { %1897 = vsyncpa [#allocation3 + $0x1], 1 }
 0x1e4   :  { %1898 = vsyncpa [#allocation6], 1 }
 0x1e5   :  { %1900 = vsyncpa [#allocation6 + $0x1], 1 }
 0x1e6   :  { %1901 = vsyncpa [#allocation4], 1 }
 0x1e7   :  { %1903 = vsyncpa [#allocation4 + $0x1], 1 }

</bundles_post_ra>
